<compile_context>
chip_gen: v6e
topology: v6e:2x2x1
jax: 0.10.0
libtpu: 0.0.40
codegen_flags: <defaults>
</compile_context>

<pallas_src>
import math

import jax
import jax.numpy as jnp
from jax import lax
from jax.experimental import pallas as pl
from jax.experimental.pallas import tpu as pltpu


# ----------------------------------------------------------------------------
# Pallas kernel: full recurrence of one LSTM layer for ONE direction.
# Grid = (num_directions,), "parallel".  program_id(0) == 1 => reverse pass.
#
#   xg_ref : (1, T, B, 4H)  pre-projected inputs  x @ W_ih + b  (gate order i,f,o,g)
#   whh_ref: (1, H, 4H)     recurrent weights     (gate order i,f,o,g)
#   h0/c0  : (1, B, H)      initial state for this direction
#   out_ref: (1, T, B, H)   per-time-step hidden states
#   hN/cN  : (1, B, H)      final state
# ----------------------------------------------------------------------------
def _lstm_recurrence_kernel(xg_ref, whh_ref, h0_ref, c0_ref,
                            out_ref, hN_ref, cN_ref):
    T = xg_ref.shape[1]
    H = h0_ref.shape[2]
    is_rev = pl.program_id(0) == 1          # direction 1 consumes x in reverse

    w_hh = whh_ref[0]                       # (H, 4H), loaded once, vreg-resident

    def step(t, carry):
        h, c = carry
        tt = jnp.where(is_rev, T - 1 - t, t)
        gates = xg_ref[0, tt] + jnp.dot(h, w_hh,
                                        preferred_element_type=jnp.float32)
        # gate columns pre-ordered [i, f, o, g]:
        # one sigmoid over the first 3H lanes, one tanh over the last H lanes.
        sig = jax.nn.sigmoid(gates[:, :3 * H])
        i_g = sig[:, 0:H]
        f_g = sig[:, H:2 * H]
        o_g = sig[:, 2 * H:3 * H]
        g_g = jnp.tanh(gates[:, 3 * H:])
        c_new = f_g * c + i_g * g_g
        h_new = o_g * jnp.tanh(c_new)
        out_ref[0, tt] = h_new              # VMEM-resident block; written back once
        return h_new, c_new

    h_n, c_n = lax.fori_loop(0, T, step, (h0_ref[0], c0_ref[0]), unroll=True)
    hN_ref[0] = h_n
    cN_ref[0] = c_n


def lstm_layer(x_tm, w_ih, w_hh, b, h0, c0):
    """One (possibly bidirectional) LSTM layer.

    x_tm : (T, B, I) time-major input
    w_ih : (D, I, 4H), w_hh : (D, H, 4H), b : (D, 1, 4H)   -- gate order [i,f,o,g]
    h0,c0: (D, B, H)
    Returns: out (T, B, D*H), h_n (D, B, H), c_n (D, B, H)
    """
    T, B, _ = x_tm.shape
    D, H, G = w_hh.shape                    # G == 4*H

    # Hoisted input projection + bias for all time steps and both directions
    # (embarrassingly parallel -> one batched matmul outside the recurrence).
    xg = jnp.einsum('tbi,dig->dtbg', x_tm, w_ih,
                    precision=lax.Precision.HIGHEST) + b[:, None, :, :]

    out, h_n, c_n = pl.pallas_call(
        _lstm_recurrence_kernel,
        out_shape=(jax.ShapeDtypeStruct((D, T, B, H), jnp.float32),
                   jax.ShapeDtypeStruct((D, B, H), jnp.float32),
                   jax.ShapeDtypeStruct((D, B, H), jnp.float32)),
        grid=(D,),
        in_specs=[pl.BlockSpec((1, T, B, G), lambda d: (d, 0, 0, 0)),
                  pl.BlockSpec((1, H, G), lambda d: (d, 0, 0)),
                  pl.BlockSpec((1, B, H), lambda d: (d, 0, 0)),
                  pl.BlockSpec((1, B, H), lambda d: (d, 0, 0))],
        out_specs=[pl.BlockSpec((1, T, B, H), lambda d: (d, 0, 0, 0)),
                   pl.BlockSpec((1, B, H), lambda d: (d, 0, 0)),
                   pl.BlockSpec((1, B, H), lambda d: (d, 0, 0))],
        compiler_params=pltpu.CompilerParams(
            dimension_semantics=("parallel",)),
    )(xg, w_hh, h0, c0)

    # (D, T, B, H) -> (T, B, D*H)   (PyTorch concat order: [fwd | rev])
    out_tm = jnp.transpose(out, (1, 2, 0, 3)).reshape(T, B, D * H)
    return out_tm, h_n, c_n


def _reorder_ifgo(w, H):
    """Reorder the 4H gate columns from PyTorch's [i, f, g, o] to [i, f, o, g]."""
    return jnp.concatenate([w[..., :2 * H], w[..., 3 * H:], w[..., 2 * H:3 * H]],
                           axis=-1)


# ----------------------------------------------------------------------------
# Encoder: mirrors the PyTorch module (nn.LSTM, batch_first=True, optional
# bidirectional, num_layers layers).
# ----------------------------------------------------------------------------
class Encoder:
    def __init__(self, INPUT_SIZE, HIDDEN_SIZE, HIDDEN_LAYER, MINI_BATCH,
                 WINDOW_SIZE, BIDIR, key):
        self.input_size = INPUT_SIZE
        self.hidden_size = HIDDEN_SIZE
        self.hidden_layer = HIDDEN_LAYER
        self.mini_batch = MINI_BATCH
        self.window_size = WINDOW_SIZE
        self.bidir = BIDIR
        self.num_dirs = 2 if BIDIR else 1

        # Parameter init matches PyTorch LSTM: U(-1/sqrt(H), 1/sqrt(H)).
        bound = 1.0 / math.sqrt(HIDDEN_SIZE)
        H = HIDDEN_SIZE

        self.params = []          # flat (layer, dir) list, PyTorch gate order (reference)
        self.kernel_params = []   # per layer: stacked + gate-reordered weights (kernel)
        for layer in range(HIDDEN_LAYER):
            in_sz = INPUT_SIZE if layer == 0 else H * self.num_dirs
            wih_l, whh_l, b_l = [], [], []
            for _d in range(self.num_dirs):
                key, k1, k2, k3, k4 = jax.random.split(key, 5)
                w_ih = jax.random.uniform(k1, (in_sz, 4 * H), jnp.float32,
                                          -bound, bound)
                w_hh = jax.random.uniform(k2, (H, 4 * H), jnp.float32,
                                          -bound, bound)
                b_ih = jax.random.uniform(k3, (4 * H,), jnp.float32,
                                          -bound, bound)
                b_hh = jax.random.uniform(k4, (4 * H,), jnp.float32,
                                          -bound, bound)
                b = (b_ih + b_hh).reshape(1, 4 * H)
                self.params.append((w_ih, w_hh, b))
                wih_l.append(_reorder_ifgo(w_ih, H))
                whh_l.append(_reorder_ifgo(w_hh, H))
                b_l.append(_reorder_ifgo(b, H))
            self.kernel_params.append((jnp.stack(wih_l, 0),
                                       jnp.stack(whh_l, 0),
                                       jnp.stack(b_l, 0)))

    def forward(self, x, hidden):
        """x: (B, T, INPUT_SIZE) batch_first, hidden = (h0, c0) each
        (num_layers * num_dirs, B, H).  Returns (output, (h_n, c_n))."""
        h0_all, c0_all = hidden
        D = self.num_dirs
        x_tm = jnp.transpose(x, (1, 0, 2))            # (T, B, I)

        hs, cs = [], []
        layer_in = x_tm
        for layer in range(self.hidden_layer):
            w_ih, w_hh, b = self.kernel_params[layer]
            h0 = h0_all[layer * D:(layer + 1) * D]
            c0 = c0_all[layer * D:(layer + 1) * D]
            out, h_n, c_n = lstm_layer(layer_in, w_ih, w_hh, b, h0, c0)
            hs.append(h_n)
            cs.append(c_n)
            layer_in = out

        output = jnp.transpose(layer_in, (1, 0, 2))   # (B, T, D*H)
        h_n = jnp.concatenate(hs, axis=0)             # (L*D, B, H)
        c_n = jnp.concatenate(cs, axis=0)
        return output, (h_n, c_n)

    def initHidden(self, MINI_BATCH):
        n = self.hidden_layer * self.num_dirs
        z = jnp.zeros((n, MINI_BATCH, self.hidden_size), jnp.float32)
        return z, z


# ----------------------------------------------------------------------------
# Pure-JAX reference (lax.scan, PyTorch gate order) for correctness checking.
# ----------------------------------------------------------------------------
def _ref_lstm_dir(x_tm, w_ih, w_hh, b, h0, c0, reverse):
    def step(carry, x_t):
        h, c = carry
        H = h.shape[-1]
        gates = (jnp.dot(x_t, w_ih, precision=lax.Precision.HIGHEST)
                 + jnp.dot(h, w_hh, precision=lax.Precision.HIGHEST)
                 + b[0])
        i_g = jax.nn.sigmoid(gates[:, 0:H])
        f_g = jax.nn.sigmoid(gates[:, H:2 * H])
        g_g = jnp.tanh(gates[:, 2 * H:3 * H])
        o_g = jax.nn.sigmoid(gates[:, 3 * H:4 * H])
        c_new = f_g * c + i_g * g_g
        h_new = o_g * jnp.tanh(c_new)
        return (h_new, c_new), h_new

    xs = x_tm[::-1] if reverse else x_tm
    (h_n, c_n), outs = lax.scan(step, (h0, c0), xs)
    if reverse:
        outs = outs[::-1]
    return outs, h_n, c_n


def _ref_forward(enc, x, hidden):
    h0_all, c0_all = hidden
    x_tm = jnp.transpose(x, (1, 0, 2))
    hs, cs = [], []
    layer_in = x_tm
    for layer in range(enc.hidden_layer):
        dir_outs = []
        for d in range(enc.num_dirs):
            idx = layer * enc.num_dirs + d
            w_ih, w_hh, b = enc.params[idx]
            out, h_n, c_n = _ref_lstm_dir(layer_in, w_ih, w_hh, b,
                                          h0_all[idx], c0_all[idx],
                                          reverse=(d == 1))
            dir_outs.append(out)
            hs.append(h_n)
            cs.append(c_n)
        layer_in = (jnp.concatenate(dir_outs, axis=-1)
                    if enc.num_dirs == 2 else dir_outs[0])
    return (jnp.transpose(layer_in, (1, 0, 2)),
            (jnp.stack(hs, 0), jnp.stack(cs, 0)))


if __name__ == "__main__":
    # ---- test 1: bidirectional, single layer -------------------------------
    INPUT_SIZE, HIDDEN_SIZE, HIDDEN_LAYER = 4, 32, 1
    MINI_BATCH, WINDOW_SIZE, BIDIR = 2, 8, True

    key = jax.random.PRNGKey(0)
    key, pkey, xkey = jax.random.split(key, 3)

    enc = Encoder(INPUT_SIZE, HIDDEN_SIZE, HIDDEN_LAYER, MINI_BATCH,
                  WINDOW_SIZE, BIDIR, pkey)
    x = jax.random.normal(xkey, (MINI_BATCH, WINDOW_SIZE, INPUT_SIZE),
                          jnp.float32)
    hidden = enc.initHidden(MINI_BATCH)

    output, (h_n, c_n) = enc.forward(x, hidden)
    jax.block_until_ready((output, h_n, c_n))

    D = 2 if BIDIR else 1
    assert output.shape == (MINI_BATCH, WINDOW_SIZE, D * HIDDEN_SIZE)
    assert h_n.shape == (HIDDEN_LAYER * D, MINI_BATCH, HIDDEN_SIZE)
    assert c_n.shape == (HIDDEN_LAYER * D, MINI_BATCH, HIDDEN_SIZE)

    ref_out, (ref_h, ref_c) = _ref_forward(enc, x, hidden)
    assert jnp.allclose(output, ref_out, atol=2e-3, rtol=2e-3)
    assert jnp.allclose(h_n, ref_h, atol=2e-3, rtol=2e-3)
    assert jnp.allclose(c_n, ref_c, atol=2e-3, rtol=2e-3)

    # ---- test 2: unidirectional, two layers --------------------------------
    key, pkey2, xkey2 = jax.random.split(key, 3)
    enc2 = Encoder(INPUT_SIZE, HIDDEN_SIZE, 2, MINI_BATCH, WINDOW_SIZE, False,
                   pkey2)
    x2 = jax.random.normal(xkey2, (MINI_BATCH, WINDOW_SIZE, INPUT_SIZE),
                           jnp.float32)
    hidden2 = enc2.initHidden(MINI_BATCH)
    out2, (h2, c2) = enc2.forward(x2, hidden2)
    jax.block_until_ready((out2, h2, c2))

    assert out2.shape == (MINI_BATCH, WINDOW_SIZE, HIDDEN_SIZE)
    assert h2.shape == (2, MINI_BATCH, HIDDEN_SIZE)
    assert c2.shape == (2, MINI_BATCH, HIDDEN_SIZE)

    ref_out2, (ref_h2, ref_c2) = _ref_forward(enc2, x2, hidden2)
    assert jnp.allclose(out2, ref_out2, atol=2e-3, rtol=2e-3)
    assert jnp.allclose(h2, ref_h2, atol=2e-3, rtol=2e-3)
    assert jnp.allclose(c2, ref_c2, atol=2e-3, rtol=2e-3)

    print("KERNEL_OK")
</pallas_src>

<mosaic_0001>
module attributes {stable_mosaic.version = 11 : i64} {
  func.func @_lstm_recurrence_kernel(%arg0: i32, %arg1: memref<1x8x2x128xf32, #tpu.memory_space<vmem>>, %arg2: memref<1x32x128xf32, #tpu.memory_space<vmem>>, %arg3: memref<1x2x32xf32, #tpu.memory_space<vmem>>, %arg4: memref<1x2x32xf32, #tpu.memory_space<vmem>>, %arg5: memref<1x8x2x32xf32, #tpu.memory_space<vmem>>, %arg6: memref<1x2x32xf32, #tpu.memory_space<vmem>>, %arg7: memref<1x2x32xf32, #tpu.memory_space<vmem>>) attributes {dimension_semantics = [#tpu.dimension_semantics<parallel>], iteration_bounds = array<i64: 2>, scalar_prefetch = 0 : i64, scratch_operands = 0 : i64, tpu.core_type = #tpu.core_type<tc>, window_params = [{transform_indices = @transform_0, window_bounds = array<i64: 1, 8, 2, 128>}, {transform_indices = @transform_1, window_bounds = array<i64: 1, 32, 128>}, {transform_indices = @transform_2, window_bounds = array<i64: 1, 2, 32>}, {transform_indices = @transform_3, window_bounds = array<i64: 1, 2, 32>}, {transform_indices = @transform_4, window_bounds = array<i64: 1, 8, 2, 32>}, {transform_indices = @transform_5, window_bounds = array<i64: 1, 2, 32>}, {transform_indices = @transform_6, window_bounds = array<i64: 1, 2, 32>}]} {
    %c1_i32 = arith.constant 1 : i32
    %0 = arith.cmpi eq, %arg0, %c1_i32 : i32
    %c0 = arith.constant 0 : index
    %c0_0 = arith.constant 0 : index
    %c0_1 = arith.constant 0 : index
    %1 = vector.load %arg2[%c0, %c0_0, %c0_1] : memref<1x32x128xf32, #tpu.memory_space<vmem>>, vector<1x32x128xf32>
    %2 = vector.shape_cast %1 : vector<1x32x128xf32> to vector<32x128xf32>
    %c0_2 = arith.constant 0 : index
    %c0_3 = arith.constant 0 : index
    %c0_4 = arith.constant 0 : index
    %3 = vector.load %arg3[%c0_2, %c0_3, %c0_4] : memref<1x2x32xf32, #tpu.memory_space<vmem>>, vector<1x2x32xf32>
    %4 = vector.shape_cast %3 : vector<1x2x32xf32> to vector<2x32xf32>
    %c0_5 = arith.constant 0 : index
    %c0_6 = arith.constant 0 : index
    %c0_7 = arith.constant 0 : index
    %5 = vector.load %arg4[%c0_5, %c0_6, %c0_7] : memref<1x2x32xf32, #tpu.memory_space<vmem>>, vector<1x2x32xf32>
    %6 = vector.shape_cast %5 : vector<1x2x32xf32> to vector<2x32xf32>
    %c0_i32 = arith.constant 0 : i32
    %c7_i32 = arith.constant 7 : i32
    %7 = arith.subi %c7_i32, %c0_i32 : i32
    %8 = arith.select %0, %7, %c0_i32 : i32
    %c0_8 = arith.constant 0 : index
    %9 = arith.index_cast %8 : i32 to index
    %c0_9 = arith.constant 0 : index
    %c0_10 = arith.constant 0 : index
    %10 = vector.load %arg1[%c0_8, %9, %c0_9, %c0_10] : memref<1x8x2x128xf32, #tpu.memory_space<vmem>>, vector<1x1x2x128xf32>
    %11 = vector.shape_cast %10 : vector<1x1x2x128xf32> to vector<2x128xf32>
    %cst = arith.constant dense<0.000000e+00> : vector<2x128xf32>
    %12 = tpu.matmul %4, %2, %cst {dimension_numbers = #tpu.dot_dimension_numbers<[1], [0], [0], [1], [0, 0, 1, 1], [], []>} : vector<2x32xf32>, vector<32x128xf32>, vector<2x128xf32> -> vector<2x128xf32>
    %13 = arith.addf %11, %12 : vector<2x128xf32>
    %14 = vector.extract_strided_slice %13 {offsets = [0, 0], sizes = [2, 96], strides = [1, 1]} : vector<2x128xf32> to vector<2x96xf32>
    %15 = arith.negf %14 : vector<2x96xf32>
    %16 = math.exp %15 : vector<2x96xf32>
    %cst_11 = arith.constant 1.000000e+00 : f32
    %17 = vector.broadcast %cst_11 : f32 to vector<2x96xf32>
    %18 = arith.addf %17, %16 : vector<2x96xf32>
    %19 = arith.divf %17, %18 : vector<2x96xf32>
    %20 = vector.extract_strided_slice %19 {offsets = [0, 0], sizes = [2, 32], strides = [1, 1]} : vector<2x96xf32> to vector<2x32xf32>
    %21 = vector.extract_strided_slice %19 {offsets = [0, 32], sizes = [2, 32], strides = [1, 1]} : vector<2x96xf32> to vector<2x32xf32>
    %22 = vector.extract_strided_slice %19 {offsets = [0, 64], sizes = [2, 32], strides = [1, 1]} : vector<2x96xf32> to vector<2x32xf32>
    %23 = vector.extract_strided_slice %13 {offsets = [0, 96], sizes = [2, 32], strides = [1, 1]} : vector<2x128xf32> to vector<2x32xf32>
    %24 = math.tanh %23 : vector<2x32xf32>
    %25 = arith.mulf %21, %6 : vector<2x32xf32>
    %26 = arith.mulf %20, %24 : vector<2x32xf32>
    %27 = arith.addf %25, %26 : vector<2x32xf32>
    %28 = math.tanh %27 : vector<2x32xf32>
    %29 = arith.mulf %22, %28 : vector<2x32xf32>
    %c0_12 = arith.constant 0 : index
    %30 = arith.index_cast %8 : i32 to index
    %c0_13 = arith.constant 0 : index
    %c0_14 = arith.constant 0 : index
    %31 = vector.load %arg5[%c0_12, %30, %c0_13, %c0_14] : memref<1x8x2x32xf32, #tpu.memory_space<vmem>>, vector<1x1x2x32xf32>
    %32 = vector.shape_cast %31 : vector<1x1x2x32xf32> to vector<2x32xf32>
    %33 = vector.shape_cast %29 : vector<2x32xf32> to vector<1x1x2x32xf32>
    tpu.vector_store %arg5[%c0_12, %30, %c0_13, %c0_14], %33 {strides = array<i32>} : memref<1x8x2x32xf32, #tpu.memory_space<vmem>>, vector<1x1x2x32xf32>,
    %c1_i32_15 = arith.constant 1 : i32
    %c7_i32_16 = arith.constant 7 : i32
    %34 = arith.subi %c7_i32_16, %c1_i32_15 : i32
    %35 = arith.select %0, %34, %c1_i32_15 : i32
    %c0_17 = arith.constant 0 : index
    %36 = arith.index_cast %35 : i32 to index
    %c0_18 = arith.constant 0 : index
    %c0_19 = arith.constant 0 : index
    %37 = vector.load %arg1[%c0_17, %36, %c0_18, %c0_19] : memref<1x8x2x128xf32, #tpu.memory_space<vmem>>, vector<1x1x2x128xf32>
    %38 = vector.shape_cast %37 : vector<1x1x2x128xf32> to vector<2x128xf32>
    %cst_20 = arith.constant dense<0.000000e+00> : vector<2x128xf32>
    %39 = tpu.matmul %29, %2, %cst_20 {dimension_numbers = #tpu.dot_dimension_numbers<[1], [0], [0], [1], [0, 0, 1, 1], [], []>} : vector<2x32xf32>, vector<32x128xf32>, vector<2x128xf32> -> vector<2x128xf32>
    %40 = arith.addf %38, %39 : vector<2x128xf32>
    %41 = vector.extract_strided_slice %40 {offsets = [0, 0], sizes = [2, 96], strides = [1, 1]} : vector<2x128xf32> to vector<2x96xf32>
    %42 = arith.negf %41 : vector<2x96xf32>
    %43 = math.exp %42 : vector<2x96xf32>
    %cst_21 = arith.constant 1.000000e+00 : f32
    %44 = vector.broadcast %cst_21 : f32 to vector<2x96xf32>
    %45 = arith.addf %44, %43 : vector<2x96xf32>
    %46 = arith.divf %44, %45 : vector<2x96xf32>
    %47 = vector.extract_strided_slice %46 {offsets = [0, 0], sizes = [2, 32], strides = [1, 1]} : vector<2x96xf32> to vector<2x32xf32>
    %48 = vector.extract_strided_slice %46 {offsets = [0, 32], sizes = [2, 32], strides = [1, 1]} : vector<2x96xf32> to vector<2x32xf32>
    %49 = vector.extract_strided_slice %46 {offsets = [0, 64], sizes = [2, 32], strides = [1, 1]} : vector<2x96xf32> to vector<2x32xf32>
    %50 = vector.extract_strided_slice %40 {offsets = [0, 96], sizes = [2, 32], strides = [1, 1]} : vector<2x128xf32> to vector<2x32xf32>
    %51 = math.tanh %50 : vector<2x32xf32>
    %52 = arith.mulf %48, %27 : vector<2x32xf32>
    %53 = arith.mulf %47, %51 : vector<2x32xf32>
    %54 = arith.addf %52, %53 : vector<2x32xf32>
    %55 = math.tanh %54 : vector<2x32xf32>
    %56 = arith.mulf %49, %55 : vector<2x32xf32>
    %c0_22 = arith.constant 0 : index
    %57 = arith.index_cast %35 : i32 to index
    %c0_23 = arith.constant 0 : index
    %c0_24 = arith.constant 0 : index
    %58 = vector.load %arg5[%c0_22, %57, %c0_23, %c0_24] : memref<1x8x2x32xf32, #tpu.memory_space<vmem>>, vector<1x1x2x32xf32>
    %59 = vector.shape_cast %58 : vector<1x1x2x32xf32> to vector<2x32xf32>
    %60 = vector.shape_cast %56 : vector<2x32xf32> to vector<1x1x2x32xf32>
    tpu.vector_store %arg5[%c0_22, %57, %c0_23, %c0_24], %60 {strides = array<i32>} : memref<1x8x2x32xf32, #tpu.memory_space<vmem>>, vector<1x1x2x32xf32>,
    %c2_i32 = arith.constant 2 : i32
    %c7_i32_25 = arith.constant 7 : i32
    %61 = arith.subi %c7_i32_25, %c2_i32 : i32
    %62 = arith.select %0, %61, %c2_i32 : i32
    %c0_26 = arith.constant 0 : index
    %63 = arith.index_cast %62 : i32 to index
    %c0_27 = arith.constant 0 : index
    %c0_28 = arith.constant 0 : index
    %64 = vector.load %arg1[%c0_26, %63, %c0_27, %c0_28] : memref<1x8x2x128xf32, #tpu.memory_space<vmem>>, vector<1x1x2x128xf32>
    %65 = vector.shape_cast %64 : vector<1x1x2x128xf32> to vector<2x128xf32>
    %cst_29 = arith.constant dense<0.000000e+00> : vector<2x128xf32>
    %66 = tpu.matmul %56, %2, %cst_29 {dimension_numbers = #tpu.dot_dimension_numbers<[1], [0], [0], [1], [0, 0, 1, 1], [], []>} : vector<2x32xf32>, vector<32x128xf32>, vector<2x128xf32> -> vector<2x128xf32>
    %67 = arith.addf %65, %66 : vector<2x128xf32>
    %68 = vector.extract_strided_slice %67 {offsets = [0, 0], sizes = [2, 96], strides = [1, 1]} : vector<2x128xf32> to vector<2x96xf32>
    %69 = arith.negf %68 : vector<2x96xf32>
    %70 = math.exp %69 : vector<2x96xf32>
    %cst_30 = arith.constant 1.000000e+00 : f32
    %71 = vector.broadcast %cst_30 : f32 to vector<2x96xf32>
    %72 = arith.addf %71, %70 : vector<2x96xf32>
    %73 = arith.divf %71, %72 : vector<2x96xf32>
    %74 = vector.extract_strided_slice %73 {offsets = [0, 0], sizes = [2, 32], strides = [1, 1]} : vector<2x96xf32> to vector<2x32xf32>
    %75 = vector.extract_strided_slice %73 {offsets = [0, 32], sizes = [2, 32], strides = [1, 1]} : vector<2x96xf32> to vector<2x32xf32>
    %76 = vector.extract_strided_slice %73 {offsets = [0, 64], sizes = [2, 32], strides = [1, 1]} : vector<2x96xf32> to vector<2x32xf32>
    %77 = vector.extract_strided_slice %67 {offsets = [0, 96], sizes = [2, 32], strides = [1, 1]} : vector<2x128xf32> to vector<2x32xf32>
    %78 = math.tanh %77 : vector<2x32xf32>
    %79 = arith.mulf %75, %54 : vector<2x32xf32>
    %80 = arith.mulf %74, %78 : vector<2x32xf32>
    %81 = arith.addf %79, %80 : vector<2x32xf32>
    %82 = math.tanh %81 : vector<2x32xf32>
    %83 = arith.mulf %76, %82 : vector<2x32xf32>
    %c0_31 = arith.constant 0 : index
    %84 = arith.index_cast %62 : i32 to index
    %c0_32 = arith.constant 0 : index
    %c0_33 = arith.constant 0 : index
    %85 = vector.load %arg5[%c0_31, %84, %c0_32, %c0_33] : memref<1x8x2x32xf32, #tpu.memory_space<vmem>>, vector<1x1x2x32xf32>
    %86 = vector.shape_cast %85 : vector<1x1x2x32xf32> to vector<2x32xf32>
    %87 = vector.shape_cast %83 : vector<2x32xf32> to vector<1x1x2x32xf32>
    tpu.vector_store %arg5[%c0_31, %84, %c0_32, %c0_33], %87 {strides = array<i32>} : memref<1x8x2x32xf32, #tpu.memory_space<vmem>>, vector<1x1x2x32xf32>,
    %c3_i32 = arith.constant 3 : i32
    %c7_i32_34 = arith.constant 7 : i32
    %88 = arith.subi %c7_i32_34, %c3_i32 : i32
    %89 = arith.select %0, %88, %c3_i32 : i32
    %c0_35 = arith.constant 0 : index
    %90 = arith.index_cast %89 : i32 to index
    %c0_36 = arith.constant 0 : index
    %c0_37 = arith.constant 0 : index
    %91 = vector.load %arg1[%c0_35, %90, %c0_36, %c0_37] : memref<1x8x2x128xf32, #tpu.memory_space<vmem>>, vector<1x1x2x128xf32>
    %92 = vector.shape_cast %91 : vector<1x1x2x128xf32> to vector<2x128xf32>
    %cst_38 = arith.constant dense<0.000000e+00> : vector<2x128xf32>
    %93 = tpu.matmul %83, %2, %cst_38 {dimension_numbers = #tpu.dot_dimension_numbers<[1], [0], [0], [1], [0, 0, 1, 1], [], []>} : vector<2x32xf32>, vector<32x128xf32>, vector<2x128xf32> -> vector<2x128xf32>
    %94 = arith.addf %92, %93 : vector<2x128xf32>
    %95 = vector.extract_strided_slice %94 {offsets = [0, 0], sizes = [2, 96], strides = [1, 1]} : vector<2x128xf32> to vector<2x96xf32>
    %96 = arith.negf %95 : vector<2x96xf32>
    %97 = math.exp %96 : vector<2x96xf32>
    %cst_39 = arith.constant 1.000000e+00 : f32
    %98 = vector.broadcast %cst_39 : f32 to vector<2x96xf32>
    %99 = arith.addf %98, %97 : vector<2x96xf32>
    %100 = arith.divf %98, %99 : vector<2x96xf32>
    %101 = vector.extract_strided_slice %100 {offsets = [0, 0], sizes = [2, 32], strides = [1, 1]} : vector<2x96xf32> to vector<2x32xf32>
    %102 = vector.extract_strided_slice %100 {offsets = [0, 32], sizes = [2, 32], strides = [1, 1]} : vector<2x96xf32> to vector<2x32xf32>
    %103 = vector.extract_strided_slice %100 {offsets = [0, 64], sizes = [2, 32], strides = [1, 1]} : vector<2x96xf32> to vector<2x32xf32>
    %104 = vector.extract_strided_slice %94 {offsets = [0, 96], sizes = [2, 32], strides = [1, 1]} : vector<2x128xf32> to vector<2x32xf32>
    %105 = math.tanh %104 : vector<2x32xf32>
    %106 = arith.mulf %102, %81 : vector<2x32xf32>
    %107 = arith.mulf %101, %105 : vector<2x32xf32>
    %108 = arith.addf %106, %107 : vector<2x32xf32>
    %109 = math.tanh %108 : vector<2x32xf32>
    %110 = arith.mulf %103, %109 : vector<2x32xf32>
    %c0_40 = arith.constant 0 : index
    %111 = arith.index_cast %89 : i32 to index
    %c0_41 = arith.constant 0 : index
    %c0_42 = arith.constant 0 : index
    %112 = vector.load %arg5[%c0_40, %111, %c0_41, %c0_42] : memref<1x8x2x32xf32, #tpu.memory_space<vmem>>, vector<1x1x2x32xf32>
    %113 = vector.shape_cast %112 : vector<1x1x2x32xf32> to vector<2x32xf32>
    %114 = vector.shape_cast %110 : vector<2x32xf32> to vector<1x1x2x32xf32>
    tpu.vector_store %arg5[%c0_40, %111, %c0_41, %c0_42], %114 {strides = array<i32>} : memref<1x8x2x32xf32, #tpu.memory_space<vmem>>, vector<1x1x2x32xf32>,
    %c4_i32 = arith.constant 4 : i32
    %c7_i32_43 = arith.constant 7 : i32
    %115 = arith.subi %c7_i32_43, %c4_i32 : i32
    %116 = arith.select %0, %115, %c4_i32 : i32
    %c0_44 = arith.constant 0 : index
    %117 = arith.index_cast %116 : i32 to index
    %c0_45 = arith.constant 0 : index
    %c0_46 = arith.constant 0 : index
    %118 = vector.load %arg1[%c0_44, %117, %c0_45, %c0_46] : memref<1x8x2x128xf32, #tpu.memory_space<vmem>>, vector<1x1x2x128xf32>
    %119 = vector.shape_cast %118 : vector<1x1x2x128xf32> to vector<2x128xf32>
    %cst_47 = arith.constant dense<0.000000e+00> : vector<2x128xf32>
    %120 = tpu.matmul %110, %2, %cst_47 {dimension_numbers = #tpu.dot_dimension_numbers<[1], [0], [0], [1], [0, 0, 1, 1], [], []>} : vector<2x32xf32>, vector<32x128xf32>, vector<2x128xf32> -> vector<2x128xf32>
    %121 = arith.addf %119, %120 : vector<2x128xf32>
    %122 = vector.extract_strided_slice %121 {offsets = [0, 0], sizes = [2, 96], strides = [1, 1]} : vector<2x128xf32> to vector<2x96xf32>
    %123 = arith.negf %122 : vector<2x96xf32>
    %124 = math.exp %123 : vector<2x96xf32>
    %cst_48 = arith.constant 1.000000e+00 : f32
    %125 = vector.broadcast %cst_48 : f32 to vector<2x96xf32>
    %126 = arith.addf %125, %124 : vector<2x96xf32>
    %127 = arith.divf %125, %126 : vector<2x96xf32>
    %128 = vector.extract_strided_slice %127 {offsets = [0, 0], sizes = [2, 32], strides = [1, 1]} : vector<2x96xf32> to vector<2x32xf32>
    %129 = vector.extract_strided_slice %127 {offsets = [0, 32], sizes = [2, 32], strides = [1, 1]} : vector<2x96xf32> to vector<2x32xf32>
    %130 = vector.extract_strided_slice %127 {offsets = [0, 64], sizes = [2, 32], strides = [1, 1]} : vector<2x96xf32> to vector<2x32xf32>
    %131 = vector.extract_strided_slice %121 {offsets = [0, 96], sizes = [2, 32], strides = [1, 1]} : vector<2x128xf32> to vector<2x32xf32>
    %132 = math.tanh %131 : vector<2x32xf32>
    %133 = arith.mulf %129, %108 : vector<2x32xf32>
    %134 = arith.mulf %128, %132 : vector<2x32xf32>
    %135 = arith.addf %133, %134 : vector<2x32xf32>
    %136 = math.tanh %135 : vector<2x32xf32>
    %137 = arith.mulf %130, %136 : vector<2x32xf32>
    %c0_49 = arith.constant 0 : index
    %138 = arith.index_cast %116 : i32 to index
    %c0_50 = arith.constant 0 : index
    %c0_51 = arith.constant 0 : index
    %139 = vector.load %arg5[%c0_49, %138, %c0_50, %c0_51] : memref<1x8x2x32xf32, #tpu.memory_space<vmem>>, vector<1x1x2x32xf32>
    %140 = vector.shape_cast %139 : vector<1x1x2x32xf32> to vector<2x32xf32>
    %141 = vector.shape_cast %137 : vector<2x32xf32> to vector<1x1x2x32xf32>
    tpu.vector_store %arg5[%c0_49, %138, %c0_50, %c0_51], %141 {strides = array<i32>} : memref<1x8x2x32xf32, #tpu.memory_space<vmem>>, vector<1x1x2x32xf32>,
    %c5_i32 = arith.constant 5 : i32
    %c7_i32_52 = arith.constant 7 : i32
    %142 = arith.subi %c7_i32_52, %c5_i32 : i32
    %143 = arith.select %0, %142, %c5_i32 : i32
    %c0_53 = arith.constant 0 : index
    %144 = arith.index_cast %143 : i32 to index
    %c0_54 = arith.constant 0 : index
    %c0_55 = arith.constant 0 : index
    %145 = vector.load %arg1[%c0_53, %144, %c0_54, %c0_55] : memref<1x8x2x128xf32, #tpu.memory_space<vmem>>, vector<1x1x2x128xf32>
    %146 = vector.shape_cast %145 : vector<1x1x2x128xf32> to vector<2x128xf32>
    %cst_56 = arith.constant dense<0.000000e+00> : vector<2x128xf32>
    %147 = tpu.matmul %137, %2, %cst_56 {dimension_numbers = #tpu.dot_dimension_numbers<[1], [0], [0], [1], [0, 0, 1, 1], [], []>} : vector<2x32xf32>, vector<32x128xf32>, vector<2x128xf32> -> vector<2x128xf32>
    %148 = arith.addf %146, %147 : vector<2x128xf32>
    %149 = vector.extract_strided_slice %148 {offsets = [0, 0], sizes = [2, 96], strides = [1, 1]} : vector<2x128xf32> to vector<2x96xf32>
    %150 = arith.negf %149 : vector<2x96xf32>
    %151 = math.exp %150 : vector<2x96xf32>
    %cst_57 = arith.constant 1.000000e+00 : f32
    %152 = vector.broadcast %cst_57 : f32 to vector<2x96xf32>
    %153 = arith.addf %152, %151 : vector<2x96xf32>
    %154 = arith.divf %152, %153 : vector<2x96xf32>
    %155 = vector.extract_strided_slice %154 {offsets = [0, 0], sizes = [2, 32], strides = [1, 1]} : vector<2x96xf32> to vector<2x32xf32>
    %156 = vector.extract_strided_slice %154 {offsets = [0, 32], sizes = [2, 32], strides = [1, 1]} : vector<2x96xf32> to vector<2x32xf32>
    %157 = vector.extract_strided_slice %154 {offsets = [0, 64], sizes = [2, 32], strides = [1, 1]} : vector<2x96xf32> to vector<2x32xf32>
    %158 = vector.extract_strided_slice %148 {offsets = [0, 96], sizes = [2, 32], strides = [1, 1]} : vector<2x128xf32> to vector<2x32xf32>
    %159 = math.tanh %158 : vector<2x32xf32>
    %160 = arith.mulf %156, %135 : vector<2x32xf32>
    %161 = arith.mulf %155, %159 : vector<2x32xf32>
    %162 = arith.addf %160, %161 : vector<2x32xf32>
    %163 = math.tanh %162 : vector<2x32xf32>
    %164 = arith.mulf %157, %163 : vector<2x32xf32>
    %c0_58 = arith.constant 0 : index
    %165 = arith.index_cast %143 : i32 to index
    %c0_59 = arith.constant 0 : index
    %c0_60 = arith.constant 0 : index
    %166 = vector.load %arg5[%c0_58, %165, %c0_59, %c0_60] : memref<1x8x2x32xf32, #tpu.memory_space<vmem>>, vector<1x1x2x32xf32>
    %167 = vector.shape_cast %166 : vector<1x1x2x32xf32> to vector<2x32xf32>
    %168 = vector.shape_cast %164 : vector<2x32xf32> to vector<1x1x2x32xf32>
    tpu.vector_store %arg5[%c0_58, %165, %c0_59, %c0_60], %168 {strides = array<i32>} : memref<1x8x2x32xf32, #tpu.memory_space<vmem>>, vector<1x1x2x32xf32>,
    %c6_i32 = arith.constant 6 : i32
    %c7_i32_61 = arith.constant 7 : i32
    %169 = arith.subi %c7_i32_61, %c6_i32 : i32
    %170 = arith.select %0, %169, %c6_i32 : i32
    %c0_62 = arith.constant 0 : index
    %171 = arith.index_cast %170 : i32 to index
    %c0_63 = arith.constant 0 : index
    %c0_64 = arith.constant 0 : index
    %172 = vector.load %arg1[%c0_62, %171, %c0_63, %c0_64] : memref<1x8x2x128xf32, #tpu.memory_space<vmem>>, vector<1x1x2x128xf32>
    %173 = vector.shape_cast %172 : vector<1x1x2x128xf32> to vector<2x128xf32>
    %cst_65 = arith.constant dense<0.000000e+00> : vector<2x128xf32>
    %174 = tpu.matmul %164, %2, %cst_65 {dimension_numbers = #tpu.dot_dimension_numbers<[1], [0], [0], [1], [0, 0, 1, 1], [], []>} : vector<2x32xf32>, vector<32x128xf32>, vector<2x128xf32> -> vector<2x128xf32>
    %175 = arith.addf %173, %174 : vector<2x128xf32>
    %176 = vector.extract_strided_slice %175 {offsets = [0, 0], sizes = [2, 96], strides = [1, 1]} : vector<2x128xf32> to vector<2x96xf32>
    %177 = arith.negf %176 : vector<2x96xf32>
    %178 = math.exp %177 : vector<2x96xf32>
    %cst_66 = arith.constant 1.000000e+00 : f32
    %179 = vector.broadcast %cst_66 : f32 to vector<2x96xf32>
    %180 = arith.addf %179, %178 : vector<2x96xf32>
    %181 = arith.divf %179, %180 : vector<2x96xf32>
    %182 = vector.extract_strided_slice %181 {offsets = [0, 0], sizes = [2, 32], strides = [1, 1]} : vector<2x96xf32> to vector<2x32xf32>
    %183 = vector.extract_strided_slice %181 {offsets = [0, 32], sizes = [2, 32], strides = [1, 1]} : vector<2x96xf32> to vector<2x32xf32>
    %184 = vector.extract_strided_slice %181 {offsets = [0, 64], sizes = [2, 32], strides = [1, 1]} : vector<2x96xf32> to vector<2x32xf32>
    %185 = vector.extract_strided_slice %175 {offsets = [0, 96], sizes = [2, 32], strides = [1, 1]} : vector<2x128xf32> to vector<2x32xf32>
    %186 = math.tanh %185 : vector<2x32xf32>
    %187 = arith.mulf %183, %162 : vector<2x32xf32>
    %188 = arith.mulf %182, %186 : vector<2x32xf32>
    %189 = arith.addf %187, %188 : vector<2x32xf32>
    %190 = math.tanh %189 : vector<2x32xf32>
    %191 = arith.mulf %184, %190 : vector<2x32xf32>
    %c0_67 = arith.constant 0 : index
    %192 = arith.index_cast %170 : i32 to index
    %c0_68 = arith.constant 0 : index
    %c0_69 = arith.constant 0 : index
    %193 = vector.load %arg5[%c0_67, %192, %c0_68, %c0_69] : memref<1x8x2x32xf32, #tpu.memory_space<vmem>>, vector<1x1x2x32xf32>
    %194 = vector.shape_cast %193 : vector<1x1x2x32xf32> to vector<2x32xf32>
    %195 = vector.shape_cast %191 : vector<2x32xf32> to vector<1x1x2x32xf32>
    tpu.vector_store %arg5[%c0_67, %192, %c0_68, %c0_69], %195 {strides = array<i32>} : memref<1x8x2x32xf32, #tpu.memory_space<vmem>>, vector<1x1x2x32xf32>,
    %c7_i32_70 = arith.constant 7 : i32
    %c7_i32_71 = arith.constant 7 : i32
    %196 = arith.subi %c7_i32_71, %c7_i32_70 : i32
    %197 = arith.select %0, %196, %c7_i32_70 : i32
    %c0_72 = arith.constant 0 : index
    %198 = arith.index_cast %197 : i32 to index
    %c0_73 = arith.constant 0 : index
    %c0_74 = arith.constant 0 : index
    %199 = vector.load %arg1[%c0_72, %198, %c0_73, %c0_74] : memref<1x8x2x128xf32, #tpu.memory_space<vmem>>, vector<1x1x2x128xf32>
    %200 = vector.shape_cast %199 : vector<1x1x2x128xf32> to vector<2x128xf32>
    %cst_75 = arith.constant dense<0.000000e+00> : vector<2x128xf32>
    %201 = tpu.matmul %191, %2, %cst_75 {dimension_numbers = #tpu.dot_dimension_numbers<[1], [0], [0], [1], [0, 0, 1, 1], [], []>} : vector<2x32xf32>, vector<32x128xf32>, vector<2x128xf32> -> vector<2x128xf32>
    %202 = arith.addf %200, %201 : vector<2x128xf32>
    %203 = vector.extract_strided_slice %202 {offsets = [0, 0], sizes = [2, 96], strides = [1, 1]} : vector<2x128xf32> to vector<2x96xf32>
    %204 = arith.negf %203 : vector<2x96xf32>
    %205 = math.exp %204 : vector<2x96xf32>
    %cst_76 = arith.constant 1.000000e+00 : f32
    %206 = vector.broadcast %cst_76 : f32 to vector<2x96xf32>
    %207 = arith.addf %206, %205 : vector<2x96xf32>
    %208 = arith.divf %206, %207 : vector<2x96xf32>
    %209 = vector.extract_strided_slice %208 {offsets = [0, 0], sizes = [2, 32], strides = [1, 1]} : vector<2x96xf32> to vector<2x32xf32>
    %210 = vector.extract_strided_slice %208 {offsets = [0, 32], sizes = [2, 32], strides = [1, 1]} : vector<2x96xf32> to vector<2x32xf32>
    %211 = vector.extract_strided_slice %208 {offsets = [0, 64], sizes = [2, 32], strides = [1, 1]} : vector<2x96xf32> to vector<2x32xf32>
    %212 = vector.extract_strided_slice %202 {offsets = [0, 96], sizes = [2, 32], strides = [1, 1]} : vector<2x128xf32> to vector<2x32xf32>
    %213 = math.tanh %212 : vector<2x32xf32>
    %214 = arith.mulf %210, %189 : vector<2x32xf32>
    %215 = arith.mulf %209, %213 : vector<2x32xf32>
    %216 = arith.addf %214, %215 : vector<2x32xf32>
    %217 = math.tanh %216 : vector<2x32xf32>
    %218 = arith.mulf %211, %217 : vector<2x32xf32>
    %c0_77 = arith.constant 0 : index
    %219 = arith.index_cast %197 : i32 to index
    %c0_78 = arith.constant 0 : index
    %c0_79 = arith.constant 0 : index
    %220 = vector.load %arg5[%c0_77, %219, %c0_78, %c0_79] : memref<1x8x2x32xf32, #tpu.memory_space<vmem>>, vector<1x1x2x32xf32>
    %221 = vector.shape_cast %220 : vector<1x1x2x32xf32> to vector<2x32xf32>
    %222 = vector.shape_cast %218 : vector<2x32xf32> to vector<1x1x2x32xf32>
    tpu.vector_store %arg5[%c0_77, %219, %c0_78, %c0_79], %222 {strides = array<i32>} : memref<1x8x2x32xf32, #tpu.memory_space<vmem>>, vector<1x1x2x32xf32>,
    %c8_i32 = arith.constant 8 : i32
    %c0_80 = arith.constant 0 : index
    %c0_81 = arith.constant 0 : index
    %c0_82 = arith.constant 0 : index
    %223 = vector.load %arg6[%c0_80, %c0_81, %c0_82] : memref<1x2x32xf32, #tpu.memory_space<vmem>>, vector<1x2x32xf32>
    %224 = vector.shape_cast %223 : vector<1x2x32xf32> to vector<2x32xf32>
    %225 = vector.shape_cast %218 : vector<2x32xf32> to vector<1x2x32xf32>
    tpu.vector_store %arg6[%c0_80, %c0_81, %c0_82], %225 {strides = array<i32>} : memref<1x2x32xf32, #tpu.memory_space<vmem>>, vector<1x2x32xf32>,
    %c0_83 = arith.constant 0 : index
    %c0_84 = arith.constant 0 : index
    %c0_85 = arith.constant 0 : index
    %226 = vector.load %arg7[%c0_83, %c0_84, %c0_85] : memref<1x2x32xf32, #tpu.memory_space<vmem>>, vector<1x2x32xf32>
    %227 = vector.shape_cast %226 : vector<1x2x32xf32> to vector<2x32xf32>
    %228 = vector.shape_cast %216 : vector<2x32xf32> to vector<1x2x32xf32>
    tpu.vector_store %arg7[%c0_83, %c0_84, %c0_85], %228 {strides = array<i32>} : memref<1x2x32xf32, #tpu.memory_space<vmem>>, vector<1x2x32xf32>,
    return
  }
  func.func @transform_0(%arg0: i32) -> (i32, i32, i32, i32) {
    %c0_i32 = arith.constant 0 : i32
    %c0_i32_0 = arith.constant 0 : i32
    %c0_i32_1 = arith.constant 0 : i32
    %c0_i32_2 = arith.constant 0 : i32
    return %arg0, %c0_i32, %c0_i32_0, %c0_i32_1 : i32, i32, i32, i32
  }
  func.func @transform_1(%arg0: i32) -> (i32, i32, i32) {
    %c0_i32 = arith.constant 0 : i32
    %c0_i32_0 = arith.constant 0 : i32
    %c0_i32_1 = arith.constant 0 : i32
    return %arg0, %c0_i32, %c0_i32_0 : i32, i32, i32
  }
  func.func @transform_2(%arg0: i32) -> (i32, i32, i32) {
    %c0_i32 = arith.constant 0 : i32
    %c0_i32_0 = arith.constant 0 : i32
    %c0_i32_1 = arith.constant 0 : i32
    return %arg0, %c0_i32, %c0_i32_0 : i32, i32, i32
  }
  func.func @transform_3(%arg0: i32) -> (i32, i32, i32) {
    %c0_i32 = arith.constant 0 : i32
    %c0_i32_0 = arith.constant 0 : i32
    %c0_i32_1 = arith.constant 0 : i32
    return %arg0, %c0_i32, %c0_i32_0 : i32, i32, i32
  }
  func.func @transform_4(%arg0: i32) -> (i32, i32, i32, i32) {
    %c0_i32 = arith.constant 0 : i32
    %c0_i32_0 = arith.constant 0 : i32
    %c0_i32_1 = arith.constant 0 : i32
    %c0_i32_2 = arith.constant 0 : i32
    return %arg0, %c0_i32, %c0_i32_0, %c0_i32_1 : i32, i32, i32, i32
  }
  func.func @transform_5(%arg0: i32) -> (i32, i32, i32) {
    %c0_i32 = arith.constant 0 : i32
    %c0_i32_0 = arith.constant 0 : i32
    %c0_i32_1 = arith.constant 0 : i32
    return %arg0, %c0_i32, %c0_i32_0 : i32, i32, i32
  }
  func.func @transform_6(%arg0: i32) -> (i32, i32, i32) {
    %c0_i32 = arith.constant 0 : i32
    %c0_i32_0 = arith.constant 0 : i32
    %c0_i32_1 = arith.constant 0 : i32
    return %arg0, %c0_i32, %c0_i32_0 : i32, i32, i32
  }
}

</mosaic_0001>

<bundles_post_ra>
// kernel: tpu_custom_call.1
= control target key start
LH: loop header
LB: loop body
LE: loop exit
PB: predicated region body
PF: predicated region fallthrough
CT: control target
= control target key end

     0   :  { %s2630_s0 = inlined_call_operand.hbm [shape: f32[2,8,2,128], index: 0, kind: input, shape index: {}]   ;;  %s2631_s1 = inlined_call_operand.hbm [shape: f32[2,32,128], index: 1, kind: input, shape index: {}]   ;;  %s2632_s2 = inlined_call_operand.hbm [shape: f32[2,2,32], index: 2, kind: input, shape index: {}]   ;;  %s2633_s3 = inlined_call_operand.vmem [shape: f32[2,2,32], index: 3, kind: input, shape index: {}]   ;;  %s2634_s4 = inlined_call_operand.hbm [shape: f32[2,8,2,32], index: 4, kind: output, shape index: {0}]   ;;  %s2635_s5 = inlined_call_operand.hbm [shape: f32[2,2,32], index: 5, kind: output, shape index: {1}]   ;;  %s2636_s6 = inlined_call_operand.hbm [shape: f32[2,2,32], index: 6, kind: output, shape index: {2}]  }
   0x1   :  { %2647 = sst [smem:[#allocation21_spill]] %s2630_s0 }
   0x2   :  { %2648 = sst [smem:[#allocation22_spill]] %s2631_s1 }
   0x3   :  { %2649 = sst [smem:[#allocation23_spill]] %s2636_s6 }
   0x4   :  { %12 = vsyncpa [#allocation3], 0 }
   0x5   :  { %14 = vsyncpa [#allocation3 + $0x1], 0 }
   0x6   :  { %15 = vsyncpa [#allocation6], 0 }
   0x7   :  { %17 = vsyncpa [#allocation6 + $0x1], 0 }
   0x8   :  { %18 = vsyncpa [#allocation4], 0 }
   0x9   :  { %20 = vsyncpa [#allocation4 + $0x1], 0 }
   0xa   :  { %21 = vsyncpa [#allocation10], 0 }
   0xb   :  { %23 = vsyncpa [#allocation10 + $0x1], 0  ;;  %s2110_s21 = smov 0   ;;  %s2112_s22 = smov 0  }
   0xc   :  { %s2114_s23 = smov 0   ;;  %s2116_s24 = smov 0  }
   0xd LB: > { %2650 = sst [smem:[#allocation16_spill]] %s2045_s21  ;;  %s2131_s25 = sadd.s32 4294967295, %s2057_s24   ;;  %s2057_s24 = sphi %s2116_s24, %s2681_s24   ;;  %s2053_s23 = sphi %s2114_s23, %s2683_s23   ;;  %s2049_s22 = sphi %s2112_s22, %s2685_s22   ;;  %s2045_s21 = sphi %s2110_s21, %s2684_s21  }
   0xe   : > { %2651 = sst [smem:[#allocation17_spill]] %s2053_s23  ;;  %s2638_s26 = sadd.s32 4294967294, %s2057_s24  }
   0xf   : > { %s2135_s27 = sadd.s32 1, %s2057_s24   ;;  %s36_s28 = sadd.s32 1, %s2053_s23 }
  0x10   : > { %2652 = sst [smem:[#allocation18_spill]] %s2135_s27  ;;  %s33_s29 = ssub.s32 %s2057_s24, %s2135_s27 }
  0x11   : > { %p43_p0 = scmp.ne.s32.totalorder %s2053_s23, %s2049_s22  ;;  %p34_p1 = scmp.eq.s32.totalorder %s33_s29, 0 }
  0x12   : > { %p44_p2 = scmp.eq.s32.totalorder %s2057_s24, 0  ;;  %p49_p3 = scmp.ne.s32.totalorder %s2049_s22, %s2045_s21 }
  0x13   : > { %p50_p4 = scmp.eq.s32.totalorder %s2131_s25, 0  ;;  %p2637_p7 = scmp.eq.s32.totalorder %s2131_s25, 1 }
  0x14   : > { %s2147_s30 = scalar_select %p34_p1, %s2053_s23, %s36_s28  }
  0x15   : > { %p45_p5 = por %p44_p2, %p43_p0  ;;  %p2149_p6 = por %p50_p4, %p49_p3 }
  0x16   : > { %2653 = sst [smem:[#allocation19_spill]] %s2147_s30  ;;  %p157_p8 = scmp.eq.s32.totalorder %s2638_s26, 1 }
  0x17   : > { %s2654_s7 = scalar_select %p2149_p6, 1, 0 }
  0x18   : > { %p1741_p10 = scmp.lt.s32.totalorder %s2057_s24, 2  ;;  %p2160_p11 = por %p2637_p7, %p43_p0 }
  0x19   : > { %p2164_p12 = por %p157_p8, %p49_p3  ;;  %s2169_s10 = sand.u32 1, %s2053_s23  }
  0x1a   : > { %s2655_s8 = scalar_select %p2160_p11, 1, 0 }
  0x1b   : > { %s2656_s9 = scalar_select %p2164_p12, 1, 0 }
  0x1c   : > { %p2171_p13 = pnand %p1741_p10, %p45_p5  ;;  %s250_s12 = sand.u32 1, %s2057_s24  }
  0x1d   : > { %2657 = sst [smem:[#allocation20_spill]] %s2656_s9  ;;  %s1532_s13 = sshll.u32 %s2169_s10, 5 }
  0x1e   : > { %s1579_s14 = sshll.u32 %s2057_s24, 9  ;;  %s2659_s1 = sld [smem:[#allocation22_spill]] }
  0x1f   : > { %s254_s18 = scalar_lea.vmem [#allocation5], %s1532_s13  ;;  %s2186_s20 = scalar_lea.sflag [#allocation6], %s250_s12 }
  0x20   : > { %s261_s19 = sshll.u32 %s254_s18, 4  ;;  %p2192_p2 = pneg %p2171_p13  ;;  %s2183_s19 = int_to_ptr.vmem [resolvable:$true] %s261_s19 }
  0x24   : > { %s2181_s17 = scalar_lea.hbm %s2659_s1, %s1579_s14  ;;  %s1854_s13 = scalar_lea.hbm %s2659_s1, 1024 }
  0x25   : > { %s1849_s28 = scalar_lea.hbm %s2181_s17, 512  ;;  %p1855_p5 = scmp.lt.s32.totalorder %s2181_s17, %s2659_s1 }
  0x26   : > { %p1850_p1 = scmp.ne.s32.totalorder %s2181_s17, %s1849_s28  ;;  %p1856_p8 = scmp.lt.s32.totalorder %s1854_s13, %s1849_s28 }
  0x28   : > { %p1852_p3 = pnand %p2192_p2, %p1850_p1  ;;  %p1857_p10 = por %p1856_p8, %p1855_p5 }
  0x2a   : > { %p1853_p4 = pneg %p1852_p3 }
  0x2c   : > { %p1858_p9 = pnand %p1857_p10, %p1853_p4 }
  0x2e   : > { %1861 = shalt.err (!%p1858_p9)
}
  0x2f   : > { %s1862_s12 = scalar_lea.vmem %s2183_s19, 512  ;;  %s2059_s26 = smov [#allocation5]  }
  0x30   : > { %p1863_p7 = scmp.ne.s32.totalorder %s2183_s19, %s1862_s12  ;;  %s1867_s14 = sshll.u32 %s2059_s26, 4  ;;  %s1868_s14 = int_to_ptr.vmem [resolvable:$false] %s1867_s14 }
  0x31   : > { %s1869_s15 = scalar_lea.vmem %s1868_s14, 1024  ;;  %p1870_p0 = scmp.lt.s32.totalorder %s2183_s19, %s1868_s14 }
  0x32   : > { %p1865_p1 = pnand %p1863_p7, %p2192_p2  ;;  %p1871_p12 = scmp.lt.s32.totalorder %s1869_s15, %s1862_s12 }
  0x34   : > { %p1866_p3 = pneg %p1865_p1  ;;  %p1872_p11 = por %p1871_p12, %p1870_p0 }
  0x36   : > { %p1873_p6 = pnand %p1872_p11, %p1866_p3 }
  0x38   : > { %1876 = shalt.err (!%p1873_p6)
}
  0x39   : > { %s2060_s28 = smov 128   ;;  %s2061_s26 = smov 8  }
  0x3a   : > { %1727 = dma.hbm_to_vmem [thread:$0]  (!%p2171_p13), %s2181_s17, 512, %s2183_s19, %s2186_s20, %s2060_s28, %s2060_s28, %s2061_s26  }
  0x3b   : > { %p294_p7 = scmp.lt.s32.totalorder %s2057_s24, 3  ;;  %s1529_s13 = sshll.u32 %s2169_s10, 4 }
  0x3c   : > { %s1578_s16 = sshll.u32 %s2057_s24, 8  ;;  %p2661_p9 = scmp.ge.s32.totalorder %s2057_s24, 1 }
  0x3d   : > { %s2663_s0 = sld [smem:[#allocation21_spill]]  ;;  %s233_s1 = scalar_lea.vmem [#allocation2], %s1529_s13 }
  0x3e   : > { %p2220_p6 = pnand %p2661_p9, %p294_p7  ;;  %s240_s30 = sshll.u32 %s233_s1, 4  ;;  %s2229_s30 = int_to_ptr.vmem [resolvable:$true] %s240_s30 }
  0x3f   : > { %s1535_s17 = sshll.u32 %s2169_s10, 1  ;;  %s230_s19 = scalar_lea.sflag [#allocation3], %s2169_s10 }
  0x40   : > { %s2662_s18 = scalar_select %p2220_p6, 1, 0 }
  0x43   : > { %s2227_s15 = scalar_lea.hbm %s2663_s0, %s1578_s16  ;;  %s1882_s12 = scalar_lea.hbm %s2663_s0, 512 }
  0x44   : > { %s1877_s28 = scalar_lea.hbm %s2227_s15, 256  ;;  %p1883_p4 = scmp.lt.s32.totalorder %s2227_s15, %s2663_s0 }
  0x45   : > { %p1878_p11 = scmp.ne.s32.totalorder %s2227_s15, %s1877_s28  ;;  %p1884_p5 = scmp.lt.s32.totalorder %s1882_s12, %s1877_s28 }
  0x47   : > { %p1880_p12 = pnand %p1878_p11, %p2192_p2  ;;  %p1885_p8 = por %p1884_p5, %p1883_p4 }
  0x49   : > { %p1881_p0 = pneg %p1880_p12 }
  0x4b   : > { %p1886_p10 = pnand %p1885_p8, %p1881_p0 }
  0x4d   : > { %1889 = shalt.err (!%p1886_p10)
}
  0x4e   : > { %s1890_s1 = scalar_lea.vmem %s2229_s30, 256  ;;  %s2062_s13 = smov [#allocation2]  }
  0x4f   : > { %p1891_p1 = scmp.ne.s32.totalorder %s2229_s30, %s1890_s1  ;;  %s1895_s23 = sshll.u32 %s2062_s13, 4  ;;  %s1896_s23 = int_to_ptr.vmem [resolvable:$false] %s1895_s23 }
  0x50   : > { %s1897_s26 = scalar_lea.vmem %s1896_s23, 512  ;;  %p1898_p9 = scmp.lt.s32.totalorder %s2229_s30, %s1896_s23 }
  0x51   : > { %p1893_p3 = pnand %p1891_p1, %p2192_p2  ;;  %p1899_p11 = scmp.lt.s32.totalorder %s1897_s26, %s1890_s1 }
  0x53   : > { %p1894_p7 = pneg %p1893_p3  ;;  %p1900_p12 = por %p1899_p11, %p1898_p9 }
  0x55   : > { %p1901_p6 = pnand %p1900_p12, %p1894_p7 }
  0x57   : > { %1904 = shalt.err (!%p1901_p6)
}
  0x58   : > { %s2063_s28 = smov 32   ;;  %s2064_s12 = smov 2  }
  0x59   : > { %1724 = dma.hbm_to_vmem [thread:$0]  (!%p2171_p13), %s2227_s15, 256, %s2229_s30, %s230_s19, %s2063_s28, %s2063_s28, %s2064_s12  }
  0x5a   : > { %s1536_s16 = sshll.u32 %s2057_s24, 5  ;;  %s275_s23 = scalar_lea.vmem [#allocation7], %s1535_s17 }
  0x5b   : > { %s280_s1 = scalar_lea.hbm %s2632_s2, %s1536_s16  ;;  %s282_s26 = sshll.u32 %s275_s23, 4  ;;  %s283_s26 = int_to_ptr.vmem [resolvable:$true] %s282_s26 }
  0x5c   : > { %s1905_s0 = scalar_lea.hbm %s280_s1, 32  ;;  %s1910_s21 = scalar_lea.hbm %s2632_s2, 64 }
  0x5d   : > { %p1906_p6 = scmp.ne.s32.totalorder %s280_s1, %s1905_s0  ;;  %p1911_p5 = scmp.lt.s32.totalorder %s280_s1, %s2632_s2 }
  0x5e   : > { %p1912_p8 = scmp.lt.s32.totalorder %s1910_s21, %s1905_s0 }
  0x5f   : > { %p1908_p0 = pnand %p1906_p6, %p2192_p2 }
  0x60   : > { %p1913_p10 = por %p1912_p8, %p1911_p5 }
  0x61   : > { %p1909_p4 = pneg %p1908_p0 }
  0x63   : > { %p1914_p1 = pnand %p1913_p10, %p1909_p4 }
  0x65   : > { %1917 = shalt.err (!%p1914_p1)
}
  0x66   : > { %s1918_s10 = scalar_lea.vmem %s283_s26, 32  ;;  %s2065_s15 = smov [#allocation7]  }
  0x67   : > { %p1919_p3 = scmp.ne.s32.totalorder %s283_s26, %s1918_s10  ;;  %s1923_s17 = sshll.u32 %s2065_s15, 4  ;;  %s1924_s17 = int_to_ptr.vmem [resolvable:$false] %s1923_s17 }
  0x68   : > { %s1925_s19 = scalar_lea.vmem %s1924_s17, 64  ;;  %p1926_p11 = scmp.lt.s32.totalorder %s283_s26, %s1924_s17 }
  0x69   : > { %p1921_p7 = pnand %p1919_p3, %p2192_p2  ;;  %p1927_p12 = scmp.lt.s32.totalorder %s1925_s19, %s1918_s10 }
  0x6b   : > { %p1922_p9 = pneg %p1921_p7  ;;  %p1928_p6 = por %p1927_p12, %p1926_p11 }
  0x6d   : > { %p1929_p0 = pnand %p1928_p6, %p1922_p9 }
  0x6f   : > { %1932 = shalt.err (!%p1929_p0)
}
  0x70   : > { %1730 = dma.hbm_to_vmem [thread:$0]  (!%p2171_p13), %s280_s1, 32, %s283_s26, %s2186_s20  }
  0x71   : > { %p2664_p4 = scmp.ne.s32.totalorder %s2662_s18, 0 }
  0x72   : > { %s2277_s0 = sand.u32 (!%p2664_p4), 1, %s2049_s22   ;;  %p2665_p2 = scmp.ne.s32.totalorder (!%p2664_p4), %s2654_s7, 0 }
  0x73   : > { %298 = sbr.rel (%p2664_p4) target bundleno = 5709 (0x164d), region = 36  ;;  %s1538_s6 = sshll.u32 (!%p2664_p4), %s2277_s0, 4 }
  0x74   : > { %s301_s21 = scalar_lea.sflag (!%p2664_p4), [#allocation3], %s2277_s0  ;;  %s2283_s27 = scalar_lea.vmem (!%p2664_p4), [#allocation2], %s1538_s6 }
  0x78   : > { %2028 = dma.done.wait (%p2665_p2), %s301_s21, 256  }
  0x79   : > { %2030 = vsyncadd (%p2665_p2), %s301_s21, 4294967040  ;;  %s309_s9 = sand.u32 1, %s2131_s25   ;;  %s1539_s11 = sshll.u32 %s2277_s0, 5 }
  0x7a   : > { %s310_s20 = scalar_lea.sflag [#allocation6], %s309_s9  ;;  %s313_s29 = scalar_lea.vmem [#allocation5], %s1539_s11 }
  0x7b   : > { %2032 = dma.done.wait (%p2665_p2), %s310_s20, 544  }
  0x7c   : > { %2034 = vsyncadd (%p2665_p2), %s310_s20, 4294966752  ;;  %v2066_v0 = vmov 0.0   ;;  %vm2067_vm0 = vmmov 0   ;;  %s2304_s18 = sshll.u32 %s2277_s0, 1  ;;  %v2306_v1 = vld [vmem:[%s313_s29 + $0x18] sm:$0xff]  ;;  %v2308_v2 = vld [vmem:[%s313_s29 + $0x10] sm:$0xff] }
  0x7d   : > { %1621 = vmatprep.subr.mxu0 %v2066_v0  ;;  %1629 = vmatprep.mubr.msk.f32.mxu0 %vm2067_vm0, %v2066_v0  ;;  %v2313_v3 = vld [vmem:[%s313_s29 + $0x8] sm:$0xff]  ;;  %v2319_v4 = vld [vmem:[%s313_s29] sm:$0xff]  ;;  %s322_s7 = scalar_lea.vmem [#allocation7], %s2304_s18  ;;  %vm390_vm1 = vcmask 261120   ;;  %p2666_p13 = scmp.eq.s32.totalorder %s2131_s25, 1  ;;  %vm498_vm2 = vcmask 254976  }
  0x7e   : > { %1632 = vmatprep.subr.mxu1 %v2066_v0  ;;  %1640 = vmatprep.mubr.msk.f32.mxu1 %vm2067_vm0, %v2066_v0  ;;  %v384_v5 = vld [vmem:[%s322_s7] sm:$0x3]  ;;  %p375_p5 = scmp.lt.s32.totalorder %s2131_s25, 1  ;;  %s2068_s30 = smov 32  }
  0x7f   : > { %1622 = vmatpush3.msra.mxu0 %v2306_v1  ;;  %1633 = vmatpush3.msra.mxu1 %v2306_v1  ;;  %s2344_s28 = scalar_select %p2666_p13, 7, 0 }
  0x80   : > { %1623 = vmatprep.subr.mxu0 %v2066_v0  ;;  %1634 = vmatprep.subr.mxu1 %v2066_v0  ;;  %s376_s14 = scalar_select %p375_p5, %s2131_s25, 1 }
  0x81   : > { %1624 = vmatpush3.msra.mxu0 %v2308_v2  ;;  %1635 = vmatpush3.msra.mxu1 %v2308_v2  ;;  %s1545_s12 = sshll.u32 %s2344_s28, 1  ;;  %s2069_s10 = smov 64  }
  0x82   : > { %1625 = vmatprep.subr.mxu0 %v2066_v0  ;;  %1636 = vmatprep.subr.mxu1 %v2066_v0  ;;  %s388_s16 = scalar_lea.vmem %s2283_s27, %s1545_s12 [#allocation2]  ;;  %s1544_s13 = sshll.u32 %s376_s14, 1 }
  0x83   : > { %1626 = vmatpush3.msra.mxu0 %v2313_v3  ;;  %1637 = vmatpush3.msra.mxu1 %v2313_v3  ;;  %v389_v6 = vld [vmem:[%s388_s16] sm:$0x3]  ;;  %s378_s26 = scalar_lea.vmem %s2633_s3, %s1544_s13  ;;  %s2362_s15 = scalar_lea.vmem [#allocation8], %s1538_s6 }
  0x84   : > { %1627 = vmatprep.subr.mxu0 %v2066_v0  ;;  %1638 = vmatprep.subr.mxu1 %v2066_v0  ;;  %v385_v11 = vld [vmem:[%s378_s26] sm:$0x3]  ;;  %s497_s17 = scalar_lea.vmem %s2362_s15, %s1545_s12 [#allocation8]  ;;  %p2667_p8 = pmov %p2666_p13 }
  0x85   : > { %1628 = vmatpush3.msra.mxu0 %v2319_v4  ;;  %1639 = vmatpush3.msra.mxu1 %v2319_v4  ;;  %p2675_p6 = scmp.ne.s32.totalorder %s2655_s8, 0 }
  0x86   : > { %1630 = vmatmul.mubr.msk.f32.vlgmr.msra.gmra.mxu0 %vm390_vm1, %v384_v5  ;;  %1643 = vmatprep.subr.mxu0 %v2066_v0  ;;  %s2381_s19 = scalar_select %p2667_p8, 6, 1 }
  0x87   : > { %1644 = vmatpush3.msra.mxu0 %v2306_v1  ;;  %1651 = vmatprep.mubr.msk.f32.mxu0 %vm2067_vm0, %v2066_v0  ;;  %p2668_p10 = pmov %p2667_p8  ;;  %p2669_p1 = pmov %p2667_p8 }
  0x88   : > { %1645 = vmatprep.subr.mxu0 %v2066_v0  ;;  %1654 = vmatprep.subr.mxu1 %v2066_v0  ;;  %s1548_s6 = sshll.u32 %s2381_s19, 1 }
  0x89   : > { %1646 = vmatpush3.msra.mxu0 %v2308_v2  ;;  %s502_s21 = scalar_lea.vmem %s2283_s27, %s1548_s6 [#allocation2]  ;;  %s605_s11 = scalar_lea.vmem %s2362_s15, %s1548_s6 [#allocation8] }
  0x8a   : > { %1647 = vmatprep.subr.mxu0 %v2066_v0  ;;  %v503_v26 = vld [vmem:[%s502_s21] sm:$0x3]  ;;  %s2404_s20 = scalar_select %p2668_p10, 5, 2 }
  0x8b   : > { %1648 = vmatpush3.msra.mxu0 %v2313_v3  ;;  %s2427_s12 = scalar_select %p2669_p1, 4, 3 }
  0x8c   : > { %1649 = vmatprep.subr.mxu0 %v2066_v0  ;;  %s1551_s29 = sshll.u32 %s2404_s20, 1  ;;  %p2670_p3 = pmov %p2669_p1 }
  0x8d   : > { %1650 = vmatpush3.msra.mxu0 %v2319_v4  ;;  %s609_s7 = scalar_lea.vmem %s2283_s27, %s1551_s29 [#allocation2]  ;;  %s712_s28 = scalar_lea.vmem %s2362_s15, %s1551_s29 [#allocation8] }
  0x8e   : > { %1665 = vmatprep.subr.mxu0 %v2066_v0  ;;  %v610_v44 = vld [vmem:[%s609_s7] sm:$0x3]  ;;  %s1554_s16 = sshll.u32 %s2427_s12, 1  ;;  %p2671_p7 = pmov %p2669_p1 }
  0x8f   : > { %s716_s14 = scalar_lea.vmem %s2283_s27, %s1554_s16 [#allocation2]  ;;  %s819_s13 = scalar_lea.vmem %s2362_s15, %s1554_s16 [#allocation8] }
  0x90   : > { %v717_v62 = vld [vmem:[%s716_s14] sm:$0x3]  ;;  %s2449_s1 = scalar_select %p2670_p3, 3, 4 }
  0x91   : > { %s2471_s19 = scalar_select %p2671_p7, 2, 5 }
  0x92   : > { %s1557_s23 = sshll.u32 %s2449_s1, 1  ;;  %p2672_p9 = pmov %p2669_p1 }
  0x93   : > { %s823_s26 = scalar_lea.vmem %s2283_s27, %s1557_s23 [#allocation2]  ;;  %s1560_s6 = sshll.u32 %s2471_s19, 1 }
  0x94   : > { %s930_s21 = scalar_lea.vmem %s2283_s27, %s1560_s6 [#allocation2]  ;;  %p2673_p11 = pmov %p2669_p1 }
  0x95   : > { %s2484_s20 = scalar_select %p2672_p9, 1, 6 }
  0x96   : > { %s2497_s12 = scalar_select %p2673_p11, 0, 7 }
  0x97   : > { %s1563_s29 = sshll.u32 %s2484_s20, 1 }
  0x98   : > { %s1037_s7 = scalar_lea.vmem %s2283_s27, %s1563_s29 [#allocation2]  ;;  %s1566_s16 = sshll.u32 %s2497_s12, 1 }
  0x99   : > { %s1144_s14 = scalar_lea.vmem %s2283_s27, %s1566_s16 [#allocation2]  ;;  %s2070_s27 = smov 96  }
  0x9a   : > { %s1247_s1 = scalar_lea.vmem %s2362_s15, %s1566_s16 [#allocation8]  ;;  %s2674_s12 = sld [smem:[#allocation23_spill]] }
 0x146   : > { %v460_v7 = vpop.f32.mrf.mxu0 }
 0x147   : > { %v464_v8 = vadd.f32 %v460_v7, %v389_v6 }
 0x148   : > { %v1631_v9 = vpop.f32.mrf.mxu0 }
 0x149   : > { %1785 = vtanh.f32 %v464_v8  ;;  %v1547_v12 = vmul.f32 -1.442695, %v464_v8 }
 0x14b   : > { %1787 = vpow2.f32 %v1547_v12 }
 0x156   : > { %v1786_v10 = vpop.eup %1785 }
 0x157   : > { %478 = vrot.lane.b32.xlu0 %v1786_v10, %s2068_s30 }
 0x158   : > { %v1788_v13 = vpop.eup %1787 }
 0x159   : > { %v468_v14 = vadd.f32 1.0, %v1788_v13 }
 0x15b   : > { %473 = vrot.lane.b32.xlu0 %v385_v11, %s2068_s30  ;;  %1789 = vrcp.f32 %v468_v14 }
 0x168   : > { %v1790_v15 = vpop.eup %1789 }
 0x1c9   : > { %v479_v16 = vpop.permute.xlu0 %478 }
 0x1ca   : > { %v481_v17 = vmul.f32 %v1790_v15, %v479_v16 }
 0x1cc   : > { %483 = vrot.lane.b32.xlu1 %v481_v17, %s2068_s30 }
 0x1cd   : > { %v474_v18 = vpop.permute.xlu0 %473 }
 0x1ce   : > { %v476_v19 = vmul.f32 %v1790_v15, %v474_v18 }
 0x23e   : > { %v484_v20 = vpop.permute.xlu1 %483 }
 0x23f   : > { %v486_v21 = vadd.f32 %v484_v20, %v476_v19 }
 0x241   : > { %1791 = vtanh.f32 %v486_v21 }
 0x24e   : > { %v1792_v22 = vpop.eup %1791 }
 0x24f   : > { %489 = vrot.lane.b32.xlu1 %v1792_v22, %s2068_s30 }
 0x2c1   : > { %v490_v23 = vpop.permute.xlu1 %489 }
 0x2c2   : > { %v492_v24 = vmul.f32 %v1790_v15, %v490_v23 }
 0x2c4   : > { %494 = vrot.lane.b32.xlu0 %v492_v24, %s2069_s10 }
 0x336   : > { %v495_v25 = vpop.permute.xlu0 %494 }
 0x337   : > { %499 = vst.msk [vmem:[%s497_s17] sm:$0x3] %vm498_vm2, %v495_v25  ;;  %1641 = vmatmul.mubr.msk.f32.vlgmr.msra.gmra.mxu1 %vm390_vm1, %v495_v25  ;;  %s926_s17 = scalar_lea.vmem %s2362_s15, %s1557_s23 [#allocation8]  ;;  %s1574_s23 = sshll.u32 %s2131_s25, 5 }
 0x338   : > { %1655 = vmatpush3.msra.mxu1 %v2306_v1  ;;  %1662 = vmatprep.mubr.msk.f32.mxu1 %vm2067_vm0, %v2066_v0  ;;  %s2535_s16 = scalar_lea.hbm %s2674_s12, %s1574_s23 }
 0x339   : > { %1656 = vmatprep.subr.mxu1 %v2066_v0 }
 0x33a   : > { %1657 = vmatpush3.msra.mxu1 %v2308_v2 }
 0x33b   : > { %1658 = vmatprep.subr.mxu1 %v2066_v0 }
 0x33c   : > { %1659 = vmatpush3.msra.mxu1 %v2313_v3 }
 0x33d   : > { %1660 = vmatprep.subr.mxu1 %v2066_v0 }
 0x33e   : > { %1661 = vmatpush3.msra.mxu1 %v2319_v4 }
 0x33f   : > { %1676 = vmatprep.subr.mxu1 %v2066_v0 }
 0x3f7   : > { %v572_v27 = vpop.f32.mrf.mxu1 }
 0x3f8   : > { %v576_v28 = vadd.f32 %v572_v27, %v503_v26 }
 0x3f9   : > { %v1642_v29 = vpop.f32.mrf.mxu1 }
 0x3fa   : > { %1793 = vtanh.f32 %v576_v28  ;;  %v1550_v31 = vmul.f32 -1.442695, %v576_v28 }
 0x3fc   : > { %1795 = vpow2.f32 %v1550_v31 }
 0x407   : > { %v1794_v30 = vpop.eup %1793 }
 0x408   : > { %586 = vrot.lane.b32.xlu1 %v1794_v30, %s2068_s30 }
 0x409   : > { %v1796_v32 = vpop.eup %1795 }
 0x40a   : > { %v580_v33 = vadd.f32 1.0, %v1796_v32 }
 0x40c   : > { %1797 = vrcp.f32 %v580_v33 }
 0x419   : > { %v1798_v34 = vpop.eup %1797 }
 0x41a   : > { %v584_v37 = vmul.f32 %v1798_v34, %v486_v21  ;;  %v824_v21 = vld [vmem:[%s823_s26] sm:$0x3]  ;;  %s367_s26 = scalar_lea.vmem [#allocation9], %s2304_s18 }
 0x47a   : > { %v587_v35 = vpop.permute.xlu1 %586 }
 0x47b   : > { %v589_v36 = vmul.f32 %v1798_v34, %v587_v35 }
 0x47d   : > { %591 = vrot.lane.b32.xlu0 %v589_v36, %s2068_s30 }
 0x4ef   : > { %v592_v38 = vpop.permute.xlu0 %591 }
 0x4f0   : > { %v594_v39 = vadd.f32 %v592_v38, %v584_v37 }
 0x4f2   : > { %1799 = vtanh.f32 %v594_v39 }
 0x4ff   : > { %v1800_v40 = vpop.eup %1799 }
 0x500   : > { %597 = vrot.lane.b32.xlu1 %v1800_v40, %s2068_s30 }
 0x572   : > { %v598_v41 = vpop.permute.xlu1 %597 }
 0x573   : > { %v600_v42 = vmul.f32 %v1798_v34, %v598_v41 }
 0x575   : > { %602 = vrot.lane.b32.xlu0 %v600_v42, %s2069_s10 }
 0x5e7   : > { %v603_v43 = vpop.permute.xlu0 %602 }
 0x5e8   : > { %606 = vst.msk [vmem:[%s605_s11] sm:$0x3] %vm498_vm2, %v603_v43  ;;  %1652 = vmatmul.mubr.msk.f32.vlgmr.msra.gmra.mxu0 %vm390_vm1, %v603_v43  ;;  %s1033_s11 = scalar_lea.vmem %s2362_s15, %s1560_s6 [#allocation8]  ;;  %s1580_s6 = sshll.u32 %s2131_s25, 8 }
 0x5e9   : > { %1666 = vmatpush3.msra.mxu0 %v2306_v1  ;;  %1673 = vmatprep.mubr.msk.f32.mxu0 %vm2067_vm0, %v2066_v0 }
 0x5ea   : > { %1667 = vmatprep.subr.mxu0 %v2066_v0 }
 0x5eb   : > { %1668 = vmatpush3.msra.mxu0 %v2308_v2 }
 0x5ec   : > { %1669 = vmatprep.subr.mxu0 %v2066_v0 }
 0x5ed   : > { %1670 = vmatpush3.msra.mxu0 %v2313_v3 }
 0x5ee   : > { %1671 = vmatprep.subr.mxu0 %v2066_v0 }
 0x5ef   : > { %1672 = vmatpush3.msra.mxu0 %v2319_v4 }
 0x5f0   : > { %1687 = vmatprep.subr.mxu0 %v2066_v0 }
 0x6a8   : > { %v679_v45 = vpop.f32.mrf.mxu0 }
 0x6a9   : > { %v683_v46 = vadd.f32 %v679_v45, %v610_v44 }
 0x6aa   : > { %v1653_v47 = vpop.f32.mrf.mxu0 }
 0x6ab   : > { %1801 = vtanh.f32 %v683_v46  ;;  %v1553_v49 = vmul.f32 -1.442695, %v683_v46 }
 0x6ad   : > { %1803 = vpow2.f32 %v1553_v49 }
 0x6b8   : > { %v1802_v48 = vpop.eup %1801 }
 0x6b9   : > { %693 = vrot.lane.b32.xlu1 %v1802_v48, %s2068_s30 }
 0x6ba   : > { %v1804_v50 = vpop.eup %1803 }
 0x6bb   : > { %v687_v51 = vadd.f32 1.0, %v1804_v50 }
 0x6bd   : > { %1805 = vrcp.f32 %v687_v51 }
 0x6ca   : > { %v1806_v52 = vpop.eup %1805 }
 0x6cb   : > { %v691_v55 = vmul.f32 %v1806_v52, %v594_v39 }
 0x72b   : > { %v694_v53 = vpop.permute.xlu1 %693 }
 0x72c   : > { %v696_v54 = vmul.f32 %v1806_v52, %v694_v53 }
 0x72e   : > { %698 = vrot.lane.b32.xlu0 %v696_v54, %s2068_s30 }
 0x7a0   : > { %v699_v56 = vpop.permute.xlu0 %698 }
 0x7a1   : > { %v701_v57 = vadd.f32 %v699_v56, %v691_v55 }
 0x7a3   : > { %1807 = vtanh.f32 %v701_v57 }
 0x7b0   : > { %v1808_v58 = vpop.eup %1807 }
 0x7b1   : > { %704 = vrot.lane.b32.xlu1 %v1808_v58, %s2068_s30 }
 0x823   : > { %v705_v59 = vpop.permute.xlu1 %704 }
 0x824   : > { %v707_v60 = vmul.f32 %v1806_v52, %v705_v59  ;;  %v1038_v52 = vld [vmem:[%s1037_s7] sm:$0x3] }
 0x826   : > { %709 = vrot.lane.b32.xlu0 %v707_v60, %s2069_s10 }
 0x898   : > { %v710_v61 = vpop.permute.xlu0 %709 }
 0x899   : > { %713 = vst.msk [vmem:[%s712_s28] sm:$0x3] %vm498_vm2, %v710_v61  ;;  %1663 = vmatmul.mubr.msk.f32.vlgmr.msra.gmra.mxu1 %vm390_vm1, %v710_v61  ;;  %s1140_s28 = scalar_lea.vmem %s2362_s15, %s1563_s29 [#allocation8]  ;;  %s2519_s29 = scalar_lea.hbm %s2635_s5, %s1574_s23 }
 0x89a   : > { %1677 = vmatpush3.msra.mxu1 %v2306_v1  ;;  %1684 = vmatprep.mubr.msk.f32.mxu1 %vm2067_vm0, %v2066_v0 }
 0x89b   : > { %1678 = vmatprep.subr.mxu1 %v2066_v0 }
 0x89c   : > { %1679 = vmatpush3.msra.mxu1 %v2308_v2 }
 0x89d   : > { %1680 = vmatprep.subr.mxu1 %v2066_v0 }
 0x89e   : > { %1681 = vmatpush3.msra.mxu1 %v2313_v3 }
 0x89f   : > { %1682 = vmatprep.subr.mxu1 %v2066_v0 }
 0x8a0   : > { %1683 = vmatpush3.msra.mxu1 %v2319_v4 }
 0x8a1   : > { %1698 = vmatprep.subr.mxu1 %v2066_v0 }
 0x959   : > { %v786_v63 = vpop.f32.mrf.mxu1 }
 0x95a   : > { %v790_v5 = vadd.f32 %v786_v63, %v717_v62 }
 0x95b   : > { %v1664_v6 = vpop.f32.mrf.mxu1 }
 0x95c   : > { %1809 = vtanh.f32 %v790_v5  ;;  %v1556_v8 = vmul.f32 -1.442695, %v790_v5 }
 0x95e   : > { %1811 = vpow2.f32 %v1556_v8 }
 0x969   : > { %v1810_v7 = vpop.eup %1809 }
 0x96a   : > { %800 = vrot.lane.b32.xlu1 %v1810_v7, %s2068_s30 }
 0x96b   : > { %v1812_v9 = vpop.eup %1811 }
 0x96c   : > { %v794_v10 = vadd.f32 1.0, %v1812_v9 }
 0x96e   : > { %1813 = vrcp.f32 %v794_v10 }
 0x97b   : > { %v1814_v11 = vpop.eup %1813 }
 0x97c   : > { %v798_v14 = vmul.f32 %v1814_v11, %v701_v57 }
 0x9dc   : > { %v801_v12 = vpop.permute.xlu1 %800 }
 0x9dd   : > { %v803_v13 = vmul.f32 %v1814_v11, %v801_v12 }
 0x9df   : > { %805 = vrot.lane.b32.xlu0 %v803_v13, %s2068_s30 }
 0xa51   : > { %v806_v15 = vpop.permute.xlu0 %805 }
 0xa52   : > { %v808_v16 = vadd.f32 %v806_v15, %v798_v14 }
 0xa54   : > { %1815 = vtanh.f32 %v808_v16 }
 0xa61   : > { %v1816_v17 = vpop.eup %1815 }
 0xa62   : > { %811 = vrot.lane.b32.xlu1 %v1816_v17, %s2068_s30 }
 0xad4   : > { %v812_v18 = vpop.permute.xlu1 %811 }
 0xad5   : > { %v814_v19 = vmul.f32 %v1814_v11, %v812_v18  ;;  %v1145_v11 = vld [vmem:[%s1144_s14] sm:$0x3]  ;;  %s2541_s14 = scalar_lea.sflag [#allocation10], %s309_s9 }
 0xad7   : > { %816 = vrot.lane.b32.xlu0 %v814_v19, %s2069_s10 }
 0xb49   : > { %v817_v20 = vpop.permute.xlu0 %816 }
 0xb4a   : > { %820 = vst.msk [vmem:[%s819_s13] sm:$0x3] %vm498_vm2, %v817_v20  ;;  %1674 = vmatmul.mubr.msk.f32.vlgmr.msra.gmra.mxu0 %vm390_vm1, %v817_v20  ;;  %s374_s13 = scalar_lea.vmem [#allocation11], %s2304_s18 }
 0xb4b   : > { %1688 = vmatpush3.msra.mxu0 %v2306_v1  ;;  %1695 = vmatprep.mubr.msk.f32.mxu0 %vm2067_vm0, %v2066_v0  ;;  %s1308_s19 = sshll.u32 %s374_s13, 4  ;;  %s2537_s19 = int_to_ptr.vmem [resolvable:$true] %s1308_s19 }
 0xb4c   : > { %1689 = vmatprep.subr.mxu0 %v2066_v0 }
 0xb4d   : > { %1690 = vmatpush3.msra.mxu0 %v2308_v2 }
 0xb4e   : > { %1691 = vmatprep.subr.mxu0 %v2066_v0 }
 0xb4f   : > { %1692 = vmatpush3.msra.mxu0 %v2313_v3 }
 0xb50   : > { %1693 = vmatprep.subr.mxu0 %v2066_v0 }
 0xb51   : > { %1694 = vmatpush3.msra.mxu0 %v2319_v4 }
 0xc0a   : > { %v893_v22 = vpop.f32.mrf.mxu0 }
 0xc0b   : > { %v897_v23 = vadd.f32 %v893_v22, %v824_v21 }
 0xc0c   : > { %v1675_v24 = vpop.f32.mrf.mxu0 }
 0xc0d   : > { %1817 = vtanh.f32 %v897_v23  ;;  %v1559_v26 = vmul.f32 -1.442695, %v897_v23 }
 0xc0f   : > { %1819 = vpow2.f32 %v1559_v26 }
 0xc1a   : > { %v1818_v25 = vpop.eup %1817 }
 0xc1b   : > { %907 = vrot.lane.b32.xlu1 %v1818_v25, %s2068_s30 }
 0xc1c   : > { %v1820_v27 = vpop.eup %1819 }
 0xc1d   : > { %v901_v28 = vadd.f32 1.0, %v1820_v27 }
 0xc1f   : > { %1821 = vrcp.f32 %v901_v28 }
 0xc2c   : > { %v1822_v29 = vpop.eup %1821 }
 0xc2d   : > { %v905_v32 = vmul.f32 %v1822_v29, %v808_v16 }
 0xc8d   : > { %v908_v30 = vpop.permute.xlu1 %907 }
 0xc8e   : > { %v910_v31 = vmul.f32 %v1822_v29, %v908_v30 }
 0xc90   : > { %912 = vrot.lane.b32.xlu0 %v910_v31, %s2068_s30 }
 0xd02   : > { %v913_v33 = vpop.permute.xlu0 %912 }
 0xd03   : > { %v915_v34 = vadd.f32 %v913_v33, %v905_v32 }
 0xd05   : > { %1823 = vtanh.f32 %v915_v34 }
 0xd12   : > { %v1824_v35 = vpop.eup %1823 }
 0xd13   : > { %918 = vrot.lane.b32.xlu1 %v1824_v35, %s2068_s30 }
 0xd85   : > { %v919_v36 = vpop.permute.xlu1 %918 }
 0xd86   : > { %v921_v37 = vmul.f32 %v1822_v29, %v919_v36 }
 0xd88   : > { %923 = vrot.lane.b32.xlu0 %v921_v37, %s2069_s10 }
 0xdfa   : > { %v924_v38 = vpop.permute.xlu0 %923 }
 0xdfb   : > { %927 = vst.msk [vmem:[%s926_s17] sm:$0x3] %vm498_vm2, %v924_v38  ;;  %1685 = vmatmul.mubr.msk.f32.vlgmr.msra.gmra.mxu1 %vm390_vm1, %v924_v38  ;;  %s1295_s17 = sshll.u32 %s367_s26, 4  ;;  %s2521_s17 = int_to_ptr.vmem [resolvable:$true] %s1295_s17 }
 0xdfc   : > { %1699 = vmatpush3.msra.mxu1 %v2306_v1  ;;  %1706 = vmatprep.mubr.msk.f32.mxu1 %vm2067_vm0, %v2066_v0  ;;  %v931_v1 = vld [vmem:[%s930_s21] sm:$0x3]  ;;  %s1279_s21 = sshll.u32 %s2362_s15, 4  ;;  %s2528_s21 = int_to_ptr.vmem [resolvable:$true] %s1279_s21 }
 0xdfd   : > { %1700 = vmatprep.subr.mxu1 %v2066_v0 }
 0xdfe   : > { %1701 = vmatpush3.msra.mxu1 %v2308_v2 }
 0xdff   : > { %1702 = vmatprep.subr.mxu1 %v2066_v0 }
 0xe00   : > { %1703 = vmatpush3.msra.mxu1 %v2313_v3 }
 0xe01   : > { %1704 = vmatprep.subr.mxu1 %v2066_v0 }
 0xe02   : > { %1705 = vmatpush3.msra.mxu1 %v2319_v4 }
 0xebb   : > { %v1000_v39 = vpop.f32.mrf.mxu1 }
 0xebc   : > { %v1004_v40 = vadd.f32 %v1000_v39, %v931_v1 }
 0xebd   : > { %v1686_v41 = vpop.f32.mrf.mxu1 }
 0xebe   : > { %1825 = vtanh.f32 %v1004_v40  ;;  %v1562_v42 = vmul.f32 -1.442695, %v1004_v40 }
 0xec0   : > { %1827 = vpow2.f32 %v1562_v42 }
 0xecb   : > { %v1826_v2 = vpop.eup %1825 }
 0xecc   : > { %1014 = vrot.lane.b32.xlu1 %v1826_v2, %s2068_s30 }
 0xecd   : > { %v1828_v3 = vpop.eup %1827 }
 0xece   : > { %v1008_v0 = vadd.f32 1.0, %v1828_v3 }
 0xed0   : > { %1829 = vrcp.f32 %v1008_v0 }
 0xedd   : > { %v1830_v4 = vpop.eup %1829 }
 0xede   : > { %v1012_v45 = vmul.f32 %v1830_v4, %v915_v34 }
 0xf3e   : > { %v1015_v43 = vpop.permute.xlu1 %1014 }
 0xf3f   : > { %v1017_v44 = vmul.f32 %v1830_v4, %v1015_v43 }
 0xf41   : > { %1019 = vrot.lane.b32.xlu0 %v1017_v44, %s2068_s30 }
 0xfb3   : > { %v1020_v46 = vpop.permute.xlu0 %1019 }
 0xfb4   : > { %v1022_v47 = vadd.f32 %v1020_v46, %v1012_v45 }
 0xfb6   : > { %1831 = vtanh.f32 %v1022_v47 }
 0xfc3   : > { %v1832_v48 = vpop.eup %1831 }
 0xfc4   : > { %1025 = vrot.lane.b32.xlu1 %v1832_v48, %s2068_s30 }
0x1036   : > { %v1026_v49 = vpop.permute.xlu1 %1025 }
0x1037   : > { %v1028_v50 = vmul.f32 %v1830_v4, %v1026_v49 }
0x1039   : > { %1030 = vrot.lane.b32.xlu0 %v1028_v50, %s2069_s10 }
0x10ab   : > { %v1031_v51 = vpop.permute.xlu0 %1030 }
0x10ac   : > { %1034 = vst.msk [vmem:[%s1033_s11] sm:$0x3] %vm498_vm2, %v1031_v51  ;;  %1696 = vmatmul.mubr.msk.f32.vlgmr.msra.gmra.mxu0 %vm390_vm1, %v1031_v51 }
0x116c   : > { %v1107_v53 = vpop.f32.mrf.mxu0 }
0x116d   : > { %v1111_v54 = vadd.f32 %v1107_v53, %v1038_v52 }
0x116e   : > { %v1697_v55 = vpop.f32.mrf.mxu0 }
0x116f   : > { %1833 = vtanh.f32 %v1111_v54  ;;  %v1565_v57 = vmul.f32 -1.442695, %v1111_v54 }
0x1171   : > { %1835 = vpow2.f32 %v1565_v57 }
0x117c   : > { %v1834_v56 = vpop.eup %1833 }
0x117d   : > { %1121 = vrot.lane.b32.xlu1 %v1834_v56, %s2068_s30 }
0x117e   : > { %v1836_v58 = vpop.eup %1835 }
0x117f   : > { %v1115_v59 = vadd.f32 1.0, %v1836_v58 }
0x1181   : > { %1837 = vrcp.f32 %v1115_v59 }
0x118e   : > { %v1838_v60 = vpop.eup %1837 }
0x118f   : > { %v1119_v63 = vmul.f32 %v1838_v60, %v1022_v47 }
0x11ef   : > { %v1122_v61 = vpop.permute.xlu1 %1121 }
0x11f0   : > { %v1124_v62 = vmul.f32 %v1838_v60, %v1122_v61 }
0x11f2   : > { %1126 = vrot.lane.b32.xlu0 %v1124_v62, %s2068_s30 }
0x1264   : > { %v1127_v5 = vpop.permute.xlu0 %1126 }
0x1265   : > { %v1129_v6 = vadd.f32 %v1127_v5, %v1119_v63 }
0x1267   : > { %1839 = vtanh.f32 %v1129_v6 }
0x1274   : > { %v1840_v7 = vpop.eup %1839 }
0x1275   : > { %1132 = vrot.lane.b32.xlu1 %v1840_v7, %s2068_s30 }
0x12e7   : > { %v1133_v8 = vpop.permute.xlu1 %1132 }
0x12e8   : > { %v1135_v9 = vmul.f32 %v1838_v60, %v1133_v8 }
0x12ea   : > { %1137 = vrot.lane.b32.xlu0 %v1135_v9, %s2069_s10 }
0x135c   : > { %v1138_v10 = vpop.permute.xlu0 %1137 }
0x135d   : > { %1141 = vst.msk [vmem:[%s1140_s28] sm:$0x3] %vm498_vm2, %v1138_v10  ;;  %1707 = vmatmul.mubr.msk.f32.vlgmr.msra.gmra.mxu1 %vm390_vm1, %v1138_v10  ;;  %s2526_s28 = scalar_lea.hbm %s2634_s4, %s1580_s6 }
0x141d   : > { %v1214_v12 = vpop.f32.mrf.mxu1 }
0x141e   : > { %v1218_v13 = vadd.f32 %v1214_v12, %v1145_v11 }
0x141f   : > { %v1708_v14 = vpop.f32.mrf.mxu1 }
0x1420   : > { %1841 = vtanh.f32 %v1218_v13  ;;  %v1568_v16 = vmul.f32 -1.442695, %v1218_v13 }
0x1422   : > { %1843 = vpow2.f32 %v1568_v16 }
0x142d   : > { %v1842_v15 = vpop.eup %1841 }
0x142e   : > { %1228 = vrot.lane.b32.xlu1 %v1842_v15, %s2068_s30 }
0x142f   : > { %v1844_v17 = vpop.eup %1843 }
0x1430   : > { %v1222_v18 = vadd.f32 1.0, %v1844_v17 }
0x1432   : > { %1845 = vrcp.f32 %v1222_v18 }
0x143f   : > { %v1846_v19 = vpop.eup %1845 }
0x1440   : > { %v1226_v22 = vmul.f32 %v1846_v19, %v1129_v6 }
0x14a0   : > { %v1229_v20 = vpop.permute.xlu1 %1228 }
0x14a1   : > { %v1231_v21 = vmul.f32 %v1846_v19, %v1229_v20 }
0x14a3   : > { %1233 = vrot.lane.b32.xlu0 %v1231_v21, %s2068_s30 }
0x1515   : > { %v1234_v23 = vpop.permute.xlu0 %1233 }
0x1516   : > { %v1236_v24 = vadd.f32 %v1234_v23, %v1226_v22 }
0x1518   : > { %1847 = vtanh.f32 %v1236_v24 }
0x1525   : > { %v1848_v25 = vpop.eup %1847 }
0x1526   : > { %1239 = vrot.lane.b32.xlu1 %v1848_v25, %s2068_s30 }
0x152a   : > { %1251 = vrot.lane.b32.xlu1 %v1236_v24, %s2070_s27  ;;  %s1933_s27 = scalar_lea.vmem %s2521_s17, 32 }
0x152b   : > { %p1934_p12 = scmp.ne.s32.totalorder %s2521_s17, %s1933_s27 }
0x152d   : > { %p1935_p0 = pnand %p1934_p12, %p2675_p6 }
0x152f   : > { %p1936_p4 = pneg %p1935_p0 }
0x1598   : > { %v1240_v26 = vpop.permute.xlu1 %1239 }
0x1599   : > { %v1242_v27 = vmul.f32 %v1846_v19, %v1240_v26 }
0x159b   : > { %1244 = vrot.lane.b32.xlu0 %v1242_v27, %s2069_s10 }
0x159c   : > { %v1252_v28 = vpop.permute.xlu1 %1251 }
0x159d   : > { %1254 = vst.msk [vmem:[%s374_s13] sm:$0x3] %vm498_vm2, %v1252_v28  ;;  %s2071_s13 = smov [#allocation9]  }
0x159e   : > { %s1937_s6 = sshll.u32 %s2071_s13, 4  ;;  %s1938_s6 = int_to_ptr.vmem [resolvable:$false] %s1937_s6 }
0x159f   : > { %p1940_p2 = scmp.lt.s32.totalorder %s2521_s17, %s1938_s6 }
0x160d   : > { %v1245_v29 = vpop.permute.xlu0 %1244 }
0x160e   : > { %1248 = vst.msk [vmem:[%s1247_s1] sm:$0x3] %vm498_vm2, %v1245_v29  ;;  %1249 = vst.msk [vmem:[%s367_s26] sm:$0x3] %vm498_vm2, %v1245_v29  ;;  %s1939_s1 = scalar_lea.vmem %s1938_s6, 64 }
0x160f   : > { %p1941_p13 = scmp.lt.s32.totalorder %s1939_s1, %s1933_s27 }
0x1611   : > { %p1942_p5 = por %p1941_p13, %p1940_p2 }
0x1613   : > { %p1943_p8 = pnand %p1942_p5, %p1936_p4 }
0x1615   : > { %1946 = shalt.err (!%p1943_p8)
}
0x1616   : > { %s1947_s25 = scalar_lea.hbm %s2519_s29, 32  ;;  %s1951_s26 = scalar_lea.hbm %s2635_s5, 64 }
0x1617   : > { %p1948_p10 = scmp.ne.s32.totalorder %s2519_s29, %s1947_s25  ;;  %p1952_p7 = scmp.lt.s32.totalorder %s2519_s29, %s2635_s5 }
0x1618   : > { %p1953_p9 = scmp.lt.s32.totalorder %s1951_s26, %s1947_s25 }
0x1619   : > { %p1949_p1 = pnand %p1948_p10, %p2675_p6 }
0x161a   : > { %p1954_p11 = por %p1953_p9, %p1952_p7 }
0x161b   : > { %p1950_p3 = pneg %p1949_p1 }
0x161d   : > { %p1955_p12 = pnand %p1954_p11, %p1950_p3 }
0x161f   : > { %1958 = shalt.err (!%p1955_p12)
}
0x1620   : > { %1716 = dma.vmem_to_hbm [thread:$0]  (%p2675_p6), %s2521_s17, 32, %s2519_s29, %s2541_s14  }
0x1621   : > { %s1256_s10 = scalar_lea.sflag [#allocation4], %s2277_s0  ;;  %s1959_s7 = scalar_lea.vmem %s2528_s21, 256 }
0x1622   : > { %p1960_p0 = scmp.ne.s32.totalorder %s2528_s21, %s1959_s7  ;;  %s2072_s18 = smov [#allocation8]  }
0x1623   : > { %s1963_s15 = sshll.u32 %s2072_s18, 4  ;;  %s1964_s15 = int_to_ptr.vmem [resolvable:$false] %s1963_s15 }
0x1624   : > { %p1961_p4 = pnand %p1960_p0, %p2675_p6  ;;  %s1965_s27 = scalar_lea.vmem %s1964_s15, 512 }
0x1625   : > { %p1966_p13 = scmp.lt.s32.totalorder %s2528_s21, %s1964_s15  ;;  %p1967_p5 = scmp.lt.s32.totalorder %s1965_s27, %s1959_s7 }
0x1626   : > { %p1962_p2 = pneg %p1961_p4 }
0x1627   : > { %p1968_p8 = por %p1967_p5, %p1966_p13 }
0x1629   : > { %p1969_p10 = pnand %p1968_p8, %p1962_p2 }
0x162b   : > { %1972 = shalt.err (!%p1969_p10)
}
0x162c   : > { %s1973_s17 = scalar_lea.hbm %s2526_s28, 256  ;;  %s1977_s6 = scalar_lea.hbm %s2634_s4, 512 }
0x162d   : > { %p1974_p1 = scmp.ne.s32.totalorder %s2526_s28, %s1973_s17  ;;  %p1978_p9 = scmp.lt.s32.totalorder %s2526_s28, %s2634_s4 }
0x162e   : > { %p1979_p11 = scmp.lt.s32.totalorder %s1977_s6, %s1973_s17 }
0x162f   : > { %p1975_p3 = pnand %p1974_p1, %p2675_p6 }
0x1630   : > { %p1980_p12 = por %p1979_p11, %p1978_p9 }
0x1631   : > { %p1976_p7 = pneg %p1975_p3 }
0x1633   : > { %p1981_p0 = pnand %p1980_p12, %p1976_p7 }
0x1635   : > { %1984 = shalt.err (!%p1981_p0)
}
0x1636   : > { %s2073_s9 = smov 2   ;;  %s1985_s23 = scalar_lea.vmem %s2537_s19, 32 }
0x1637   : > { %1715 = dma.vmem_to_hbm [thread:$0]  (%p2675_p6), %s2528_s21, 256, %s2526_s28, %s1256_s10, %s2068_s30, %s2068_s30, %s2073_s9  }
0x1638   : > { %p1986_p4 = scmp.ne.s32.totalorder %s2537_s19, %s1985_s23  ;;  %s2074_s26 = smov [#allocation11]  }
0x1639   : > { %s1989_s11 = sshll.u32 %s2074_s26, 4  ;;  %s1990_s11 = int_to_ptr.vmem [resolvable:$false] %s1989_s11 }
0x163a   : > { %p1987_p2 = pnand %p1986_p4, %p2675_p6  ;;  %s1991_s20 = scalar_lea.vmem %s1990_s11, 64 }
0x163b   : > { %p1992_p5 = scmp.lt.s32.totalorder %s2537_s19, %s1990_s11  ;;  %p1993_p8 = scmp.lt.s32.totalorder %s1991_s20, %s1985_s23 }
0x163c   : > { %p1988_p13 = pneg %p1987_p2 }
0x163d   : > { %p1994_p10 = por %p1993_p8, %p1992_p5 }
0x163f   : > { %p1995_p1 = pnand %p1994_p10, %p1988_p13 }
0x1641   : > { %1998 = shalt.err (!%p1995_p1)
}
0x1642   : > { %s1999_s0 = scalar_lea.hbm %s2535_s16, 32  ;;  %s2003_s28 = scalar_lea.hbm %s2674_s12, 64 }
0x1643   : > { %p2000_p3 = scmp.ne.s32.totalorder %s2535_s16, %s1999_s0  ;;  %p2004_p11 = scmp.lt.s32.totalorder %s2535_s16, %s2674_s12 }
0x1644   : > { %p2005_p12 = scmp.lt.s32.totalorder %s2003_s28, %s1999_s0 }
0x1645   : > { %p2001_p7 = pnand %p2000_p3, %p2675_p6 }
0x1646   : > { %p2006_p0 = por %p2005_p12, %p2004_p11 }
0x1647   : > { %p2002_p9 = pneg %p2001_p7 }
0x1649   : > { %p2007_p4 = pnand %p2006_p0, %p2002_p9 }
0x164b   : > { %2010 = shalt.err (!%p2007_p4)
}
0x164c   : > { %1717 = dma.vmem_to_hbm [thread:$0]  (%p2675_p6), %s2537_s19, 32, %s2535_s16, %s2541_s14  }
0x164d PF: > { %s2676_s18 = sld [smem:[#allocation16_spill]]  ;;  %p2679_p13 = scmp.ge.s32.totalorder %s2057_s24, 2 }
0x164e   : > { %s2677_s15 = sld [smem:[#allocation20_spill]] }
0x1653   : > { %s1320_s27 = sand.u32 1, %s2676_s18  }
0x1654   : > { %p2678_p2 = scmp.ne.s32.totalorder %s2677_s15, 0  ;;  %s1321_s17 = scalar_lea.sflag [#allocation4], %s1320_s27 }
0x1656   : > { %p1732_p5 = pnand %p2679_p13, %p2678_p2 }
0x1658   : > { %p1733_p8 = pneg %p1732_p5 }
0x165a   : > { %2036 = dma.done.wait (%p1733_p8), %s1321_s17, 256  }
0x165b   : > { %2038 = vsyncadd (%p1733_p8), %s1321_s17, 4294967040  ;;  %s2680_s29 = sadd.s32 4294967294, %s2057_s24  }
0x165c   : > { %s1329_s13 = sand.u32 1, %s2680_s29  }
0x165d   : > { %s1330_s8 = scalar_lea.sflag [#allocation10], %s1329_s13 }
0x165e   : > { %2040 = dma.done.wait (%p1733_p8), %s1330_s8, 64  }
0x165f   : > { %2042 = vsyncadd (%p1733_p8), %s1330_s8, 4294967232  ;;  %s2681_s24 = sld [smem:[#allocation18_spill]]  ;;  %s2684_s21 = smov %s2049_s22 }
0x1660   : > { %s2682_s19 = sld [smem:[#allocation17_spill]] }
0x1661   : > { %s2683_s23 = sld [smem:[#allocation19_spill]] }
0x1665   : > { %p26_p6 = scmp.ge.s32.totalorder %s2681_s24, 4  }
0x1666   : > { %s2685_s22 = smov %s2682_s19 }
0x1667   :  { %28 = sbr.rel (!%p26_p6) target bundleno = 13 (0xd), region = 156 }
0x166c   :  { %1344 = vsyncpa [#allocation3], 1 }
0x166d   :  { %1346 = vsyncpa [#allocation3 + $0x1], 1 }
0x166e   :  { %1347 = vsyncpa [#allocation6], 1 }
0x166f   :  { %1349 = vsyncpa [#allocation6 + $0x1], 1 }
0x1670   :  { %1350 = vsyncpa [#allocation4], 1 }
0x1671   :  { %1352 = vsyncpa [#allocation4 + $0x1], 1 }
0x1672   :  { %1353 = vsyncpa [#allocation10], 1 }
0x1673   :  { %1355 = vsyncpa [#allocation10 + $0x1], 1 }

</bundles_post_ra>
